<compile_context>
chip_gen: v6e
topology: v6e:2x2x1
jax: 0.10.0
libtpu: 0.0.40
codegen_flags: <defaults>
</compile_context>

<pallas_src>
import functools

import jax
import jax.numpy as jnp
import numpy as np
from jax import lax
from jax.experimental import pallas as pl
from jax.experimental.pallas import tpu as pltpu


def pad_ico_kernel(x_ref, o_ref, *, r, R):
    """x_ref: (R, 5, H, W, TN)   o_ref: (R, 5, H+2, W+2, TN)."""
    H, W = 2 ** r, 2 ** (r + 1)
    half = 2 ** r                      # == H
    tn = x_ref.shape[-1]
    dt = o_ref.dtype

    def roll_R(a, shift):
        """torch .roll(shift) over the leading R axis of a small strip."""
        if R == 1 or shift % R == 0:
            return a
        s = shift % R
        return jnp.concatenate(
            [lax.slice_in_dim(a, R - s, R, axis=0),
             lax.slice_in_dim(a, 0, R - s, axis=0)], axis=0)

    # ------------------------------------------------------------------ (1)
    # interior: one large lane-dense copy
    o_ref[:, :, 1:H + 1, 1:W + 1, :] = x_ref[...]

    # ------------------------------------------------------------- (2)-(7)
    # Boundary strips.  Loop over the 5 destination charts; only the 1-wide
    # row/column strip that is actually needed is loaded from the statically
    # shifted source chart (no rolled copies of x), and every strip is written
    # with a single lane-dense store.  The flip + row<->column transpose of a
    # strip is expressed as a concatenation of its lane-rows in reverse order;
    # each piece is full lane width over the batch axis, so this stays fully
    # vectorized across lanes (the O(H) lane-row moves are inherent to the
    # chart transpose, there are no per-element masked stores).
    for c in range(5):
        cm1 = (c - 1) % 5              # source chart for roll(+1, charts)
        cp1 = (c + 1) % 5              # source chart for roll(-1, charts)

        # (2) top row, cols 1..half : last row of chart c-1 (right half)
        o_ref[:, c:c + 1, 0:1, 1:half + 1, :] = \
            x_ref[:, cm1:cm1 + 1, H - 1:H, half:W, :]

        # (3) top row, cols half+1..W : last column of chart c-1,
        #     R-rolled by -1, traversed bottom-to-top (the flip)
        strip = jnp.concatenate(
            [x_ref[:, cm1:cm1 + 1, h:h + 1, W - 1:W, :]
             for h in range(H - 1, -1, -1)], axis=3)          # (R,1,1,H,tn)
        o_ref[:, c:c + 1, 0:1, half + 1:W + 1, :] = roll_R(strip, -1)

        # (4) bottom row, cols 2..half : first column of chart c+1,
        #     R-rolled by -1, traversed bottom-to-top.  (The original module
        #     also writes col half+1 here, but that cell is immediately
        #     overwritten by step (5), so it is skipped to keep the write
        #     regions disjoint and the output fully covered.)
        if H > 1:
            strip = jnp.concatenate(
                [x_ref[:, cp1:cp1 + 1, h:h + 1, 0:1, :]
                 for h in range(H - 1, 0, -1)], axis=3)       # (R,1,1,H-1,tn)
            o_ref[:, c:c + 1, H + 1:H + 2, 2:half + 1, :] = roll_R(strip, -1)

        # (5) bottom row, cols half+1..W : first row of chart c+1 (left half)
        o_ref[:, c:c + 1, H + 1:H + 2, half + 1:W + 1, :] = \
            x_ref[:, cp1:cp1 + 1, 0:1, 0:half, :]

        # (6) left column, rows 1..H : last row of chart c-1 (left half),
        #     R-rolled by +1, traversed right-to-left
        strip = jnp.concatenate(
            [x_ref[:, cm1:cm1 + 1, H - 1:H, w:w + 1, :]
             for w in range(half - 1, -1, -1)], axis=2)       # (R,1,H,1,tn)
        o_ref[:, c:c + 1, 1:H + 1, 0:1, :] = roll_R(strip, 1)

        # (7) right column, rows 2..H+1 : first row of chart c+1 (right half),
        #     R-rolled by +1, traversed right-to-left
        strip = jnp.concatenate(
            [x_ref[:, cp1:cp1 + 1, 0:1, w:w + 1, :]
             for w in range(W - 1, half - 1, -1)], axis=2)    # (R,1,H,1,tn)
        o_ref[:, c:c + 1, 2:H + 2, W + 1:W + 2, :] = roll_R(strip, 1)

    # ------------------------------------------------------------------ (8)
    # The 5 cells per chart left at flat index 0 by the torch gather all read
    # x[..., 0, 0, 0, 0] of the same batch element: three merged stores.
    base = x_ref[0:1, 0:1, 0:1, 0:1, :]                       # (1,1,1,1,tn)
    o_ref[:, :, 0:1, 0:1, :] = jnp.broadcast_to(base, (R, 5, 1, 1, tn))
    o_ref[:, :, 0:2, W + 1:W + 2, :] = jnp.broadcast_to(base, (R, 5, 2, 1, tn))
    o_ref[:, :, H + 1:H + 2, 0:2, :] = jnp.broadcast_to(base, (R, 5, 1, 2, tn))

    # ---------------------------------------------------- CleanVertices ---
    # Default PadIco (smooth_vertices=False, preserve_vertices=False) zeroes
    # the two vertex pixels (h=0, w=W-1) and (h=H-1, w=0) of every chart
    # before the gather.  Those pixels are read only by the interior copy and
    # by one element of each of steps (3), (4), (6), (7); zero exactly those
    # output cells (done last, so these stores overwrite the copies above).
    z11 = jnp.zeros((R, 5, 1, 1, tn), dt)
    z21 = jnp.zeros((R, 5, 2, 1, tn), dt)
    z12 = jnp.zeros((R, 5, 1, 2, tn), dt)
    o_ref[:, :, 0:2, W:W + 1, :] = z21        # step (3) j=H-1  + interior (0, W-1)
    o_ref[:, :, 2:3, W + 1:W + 2, :] = z11    # step (7) i=0
    o_ref[:, :, H:H + 1, 0:2, :] = z12        # step (6) i=H-1  + interior (H-1, 0)
    o_ref[:, :, H + 1:H + 2, 2:3, :] = z11    # step (4) j=0


def _choose_tn(N, r, R, itemsize):
    """Pick the lane-block size TN (batch lanes per grid step)."""
    LANE = 128
    if N <= LANE:
        return N                       # block last dim == full array dim: OK
    H, W = 2 ** r, 2 ** (r + 1)
    # bytes per lane for (input block + output block), each double-buffered
    # by the BlockSpec pipeline.
    per_lane = 2 * itemsize * R * 5 * (H * W + (H + 2) * (W + 2))
    # ~8 MiB of pipeline buffers fits comfortably inside the smallest default
    # scoped-VMEM limit (v5e: 16 MiB, v6e/v7x: 32 MiB; v7x has only 64 MiB
    # physical) while still being large enough to amortise the ~0.35 us
    # per-grid-step overhead.
    budget = 8 * 1024 * 1024
    cap_blocks = max(1, budget // (per_lane * LANE))
    n_blocks = pl.cdiv(N, LANE)
    # keep at least 2 grid steps when possible so both v7x TensorCores get work
    if n_blocks >= 2:
        tn_blocks = min(cap_blocks, max(1, n_blocks // 2))
    else:
        tn_blocks = 1
    return tn_blocks * LANE


def pad_ico_forward(x, r, R):
    """x: (B, C, R, 5, H, W) -> (B, C, R, 5, H+2, W+2)."""
    assert r >= 1, "r must be >= 1"
    B, C = x.shape[0], x.shape[1]
    H, W = 2 ** r, 2 ** (r + 1)
    assert x.shape[2:] == (R, 5, H, W), x.shape
    N = B * C

    # lane-dense layout: fused batch axis N = B*C on the last (lane) axis.
    # (Wrapper transposes are layout plumbing done by XLA outside the kernel.)
    xt = jnp.transpose(x.reshape(N, R, 5, H, W), (1, 2, 3, 4, 0))  # (R,5,H,W,N)

    TN = _choose_tn(N, r, R, x.dtype.itemsize)
    n_pad = pl.cdiv(N, TN) * TN
    if n_pad != N:
        xt = jnp.pad(xt, ((0, 0),) * 4 + ((0, n_pad - N),))
    grid = (n_pad // TN,)

    out = pl.pallas_call(
        functools.partial(pad_ico_kernel, r=r, R=R),
        out_shape=jax.ShapeDtypeStruct((R, 5, H + 2, W + 2, n_pad), x.dtype),
        grid=grid,
        in_specs=[pl.BlockSpec((R, 5, H, W, TN),
                               lambda i: (0, 0, 0, 0, i))],
        out_specs=pl.BlockSpec((R, 5, H + 2, W + 2, TN),
                               lambda i: (0, 0, 0, 0, i)),
        compiler_params=pltpu.CompilerParams(
            dimension_semantics=("parallel",)),
    )(xt)

    out = out[..., :N]                                    # drop lane padding
    out = jnp.transpose(out, (4, 0, 1, 2, 3))             # (N, R, 5, H+2, W+2)
    return out.reshape(B, C, R, 5, H + 2, W + 2)


def pad_ico_reference(x_np, r, R):
    """Pure numpy mirror of the torch module (index-gather formulation)."""
    H, W = 2 ** r, 2 ** (r + 1)
    idx_in = np.arange(R * 5 * H * W, dtype=np.int64).reshape(R, 5, H, W)
    idx_out = np.zeros((R, 5, H + 2, W + 2), dtype=np.int64)
    idx_out[..., 1:-1, 1:-1] = idx_in
    idx_out[..., 0, 1:2 ** r + 1] = np.roll(idx_in, 1, axis=-3)[..., -1, 2 ** r:]
    idx_out[..., 0, 2 ** r + 1:-1] = np.flip(
        np.roll(np.roll(idx_in, 1, axis=-3), -1, axis=-4)[..., :, -1], axis=-1)
    idx_out[..., -1, 2:2 ** r + 2] = np.flip(
        np.roll(np.roll(idx_in, -1, axis=-3), -1, axis=-4)[..., :, 0], axis=-1)
    idx_out[..., -1, 2 ** r + 1:-1] = np.roll(idx_in, -1, axis=-3)[..., 0, 0:2 ** r]
    idx_out[..., 1:-1, 0] = np.flip(
        np.roll(np.roll(idx_in, 1, axis=-3), 1, axis=-4)[..., -1, 0:2 ** r], axis=-1)
    idx_out[..., 2:, -1] = np.flip(
        np.roll(np.roll(idx_in, -1, axis=-3), 1, axis=-4)[..., 0, 2 ** r:], axis=-1)

    xm = np.array(x_np)
    xm[..., 0, W - 1] = 0.0      # CleanVertices
    xm[..., H - 1, 0] = 0.0
    xflat = xm.reshape(*x_np.shape[:-4], R * 5 * H * W)
    return xflat[..., idx_out]


if __name__ == "__main__":
    configs = [
        dict(r=3, R=1, B=2, C=4),    # GaugeUpLayer-style usage (Rin = 1)
        dict(r=2, R=2, B=2, C=4),    # exercises the R-roll path
        dict(r=3, R=1, B=3, C=50),   # N = 150 > 128: multi-block grid + lane padding
    ]
    for cfg in configs:
        r, R, B, C = cfg["r"], cfg["R"], cfg["B"], cfg["C"]
        H, W = 2 ** r, 2 ** (r + 1)
        key = jax.random.PRNGKey(0)
        x = jax.random.normal(key, (B, C, R, 5, H, W), dtype=jnp.float32)

        y = jax.block_until_ready(pad_ico_forward(x, r, R))
        y_ref = pad_ico_reference(np.asarray(x), r, R)

        assert y.shape == (B, C, R, 5, H + 2, W + 2)
        np.testing.assert_allclose(np.asarray(y), y_ref, rtol=0, atol=0)

    print("KERNEL_OK")
</pallas_src>

<mosaic_0001>
module attributes {stable_mosaic.version = 11 : i64} {
  func.func @pad_ico_kernel(%arg0: i32, %arg1: memref<1x5x8x16x8xf32, #tpu.memory_space<vmem>>, %arg2: memref<1x5x10x18x8xf32, #tpu.memory_space<vmem>>) attributes {dimension_semantics = [#tpu.dimension_semantics<parallel>], iteration_bounds = array<i64: 1>, scalar_prefetch = 0 : i64, scratch_operands = 0 : i64, tpu.core_type = #tpu.core_type<tc>, window_params = [{transform_indices = @transform_0, window_bounds = array<i64: 1, 5, 8, 16, 8>}, {transform_indices = @transform_1, window_bounds = array<i64: 1, 5, 10, 18, 8>}]} {
    %c0 = arith.constant 0 : index
    %c0_0 = arith.constant 0 : index
    %c0_1 = arith.constant 0 : index
    %c0_2 = arith.constant 0 : index
    %c0_3 = arith.constant 0 : index
    %0 = vector.load %arg1[%c0, %c0_0, %c0_1, %c0_2, %c0_3] : memref<1x5x8x16x8xf32, #tpu.memory_space<vmem>>, vector<1x5x8x16x8xf32>
    %c0_4 = arith.constant 0 : index
    %c0_5 = arith.constant 0 : index
    %c1 = arith.constant 1 : index
    %c1_6 = arith.constant 1 : index
    %c0_7 = arith.constant 0 : index
    %1 = vector.load %arg2[%c0_4, %c0_5, %c1, %c1_6, %c0_7] : memref<1x5x10x18x8xf32, #tpu.memory_space<vmem>>, vector<1x5x8x16x8xf32>
    tpu.vector_store %arg2[%c0_4, %c0_5, %c1, %c1_6, %c0_7], %0 {strides = array<i32>} : memref<1x5x10x18x8xf32, #tpu.memory_space<vmem>>, vector<1x5x8x16x8xf32>,
    %c0_8 = arith.constant 0 : index
    %c4 = arith.constant 4 : index
    %c7 = arith.constant 7 : index
    %c8 = arith.constant 8 : index
    %c0_9 = arith.constant 0 : index
    %2 = vector.load %arg1[%c0_8, %c4, %c7, %c8, %c0_9] : memref<1x5x8x16x8xf32, #tpu.memory_space<vmem>>, vector<1x1x1x8x8xf32>
    %c0_10 = arith.constant 0 : index
    %c0_11 = arith.constant 0 : index
    %c0_12 = arith.constant 0 : index
    %c1_13 = arith.constant 1 : index
    %c0_14 = arith.constant 0 : index
    %3 = vector.load %arg2[%c0_10, %c0_11, %c0_12, %c1_13, %c0_14] : memref<1x5x10x18x8xf32, #tpu.memory_space<vmem>>, vector<1x1x1x8x8xf32>
    tpu.vector_store %arg2[%c0_10, %c0_11, %c0_12, %c1_13, %c0_14], %2 {strides = array<i32>} : memref<1x5x10x18x8xf32, #tpu.memory_space<vmem>>, vector<1x1x1x8x8xf32>,
    %c0_15 = arith.constant 0 : index
    %c4_16 = arith.constant 4 : index
    %c7_17 = arith.constant 7 : index
    %c15 = arith.constant 15 : index
    %c0_18 = arith.constant 0 : index
    %4 = vector.load %arg1[%c0_15, %c4_16, %c7_17, %c15, %c0_18] : memref<1x5x8x16x8xf32, #tpu.memory_space<vmem>>, vector<1x1x1x1x8xf32>
    %c0_19 = arith.constant 0 : index
    %c4_20 = arith.constant 4 : index
    %c6 = arith.constant 6 : index
    %c15_21 = arith.constant 15 : index
    %c0_22 = arith.constant 0 : index
    %5 = vector.load %arg1[%c0_19, %c4_20, %c6, %c15_21, %c0_22] : memref<1x5x8x16x8xf32, #tpu.memory_space<vmem>>, vector<1x1x1x1x8xf32>
    %c0_23 = arith.constant 0 : index
    %c4_24 = arith.constant 4 : index
    %c5 = arith.constant 5 : index
    %c15_25 = arith.constant 15 : index
    %c0_26 = arith.constant 0 : index
    %6 = vector.load %arg1[%c0_23, %c4_24, %c5, %c15_25, %c0_26] : memref<1x5x8x16x8xf32, #tpu.memory_space<vmem>>, vector<1x1x1x1x8xf32>
    %c0_27 = arith.constant 0 : index
    %c4_28 = arith.constant 4 : index
    %c4_29 = arith.constant 4 : index
    %c15_30 = arith.constant 15 : index
    %c0_31 = arith.constant 0 : index
    %7 = vector.load %arg1[%c0_27, %c4_28, %c4_29, %c15_30, %c0_31] : memref<1x5x8x16x8xf32, #tpu.memory_space<vmem>>, vector<1x1x1x1x8xf32>
    %c0_32 = arith.constant 0 : index
    %c4_33 = arith.constant 4 : index
    %c3 = arith.constant 3 : index
    %c15_34 = arith.constant 15 : index
    %c0_35 = arith.constant 0 : index
    %8 = vector.load %arg1[%c0_32, %c4_33, %c3, %c15_34, %c0_35] : memref<1x5x8x16x8xf32, #tpu.memory_space<vmem>>, vector<1x1x1x1x8xf32>
    %c0_36 = arith.constant 0 : index
    %c4_37 = arith.constant 4 : index
    %c2 = arith.constant 2 : index
    %c15_38 = arith.constant 15 : index
    %c0_39 = arith.constant 0 : index
    %9 = vector.load %arg1[%c0_36, %c4_37, %c2, %c15_38, %c0_39] : memref<1x5x8x16x8xf32, #tpu.memory_space<vmem>>, vector<1x1x1x1x8xf32>
    %c0_40 = arith.constant 0 : index
    %c4_41 = arith.constant 4 : index
    %c1_42 = arith.constant 1 : index
    %c15_43 = arith.constant 15 : index
    %c0_44 = arith.constant 0 : index
    %10 = vector.load %arg1[%c0_40, %c4_41, %c1_42, %c15_43, %c0_44] : memref<1x5x8x16x8xf32, #tpu.memory_space<vmem>>, vector<1x1x1x1x8xf32>
    %c0_45 = arith.constant 0 : index
    %c4_46 = arith.constant 4 : index
    %c0_47 = arith.constant 0 : index
    %c15_48 = arith.constant 15 : index
    %c0_49 = arith.constant 0 : index
    %11 = vector.load %arg1[%c0_45, %c4_46, %c0_47, %c15_48, %c0_49] : memref<1x5x8x16x8xf32, #tpu.memory_space<vmem>>, vector<1x1x1x1x8xf32>
    %12 = tpu.concatenate %4, %5, %6, %7, %8, %9, %10, %11 in 3 : vector<1x1x1x1x8xf32>, vector<1x1x1x1x8xf32>, vector<1x1x1x1x8xf32>, vector<1x1x1x1x8xf32>, vector<1x1x1x1x8xf32>, vector<1x1x1x1x8xf32>, vector<1x1x1x1x8xf32>, vector<1x1x1x1x8xf32> -> vector<1x1x1x8x8xf32>
    %c0_50 = arith.constant 0 : index
    %c0_51 = arith.constant 0 : index
    %c0_52 = arith.constant 0 : index
    %c9 = arith.constant 9 : index
    %c0_53 = arith.constant 0 : index
    %13 = vector.load %arg2[%c0_50, %c0_51, %c0_52, %c9, %c0_53] : memref<1x5x10x18x8xf32, #tpu.memory_space<vmem>>, vector<1x1x1x8x8xf32>
    tpu.vector_store %arg2[%c0_50, %c0_51, %c0_52, %c9, %c0_53], %12 {strides = array<i32>} : memref<1x5x10x18x8xf32, #tpu.memory_space<vmem>>, vector<1x1x1x8x8xf32>,
    %c0_54 = arith.constant 0 : index
    %c1_55 = arith.constant 1 : index
    %c7_56 = arith.constant 7 : index
    %c0_57 = arith.constant 0 : index
    %c0_58 = arith.constant 0 : index
    %14 = vector.load %arg1[%c0_54, %c1_55, %c7_56, %c0_57, %c0_58] : memref<1x5x8x16x8xf32, #tpu.memory_space<vmem>>, vector<1x1x1x1x8xf32>
    %c0_59 = arith.constant 0 : index
    %c1_60 = arith.constant 1 : index
    %c6_61 = arith.constant 6 : index
    %c0_62 = arith.constant 0 : index
    %c0_63 = arith.constant 0 : index
    %15 = vector.load %arg1[%c0_59, %c1_60, %c6_61, %c0_62, %c0_63] : memref<1x5x8x16x8xf32, #tpu.memory_space<vmem>>, vector<1x1x1x1x8xf32>
    %c0_64 = arith.constant 0 : index
    %c1_65 = arith.constant 1 : index
    %c5_66 = arith.constant 5 : index
    %c0_67 = arith.constant 0 : index
    %c0_68 = arith.constant 0 : index
    %16 = vector.load %arg1[%c0_64, %c1_65, %c5_66, %c0_67, %c0_68] : memref<1x5x8x16x8xf32, #tpu.memory_space<vmem>>, vector<1x1x1x1x8xf32>
    %c0_69 = arith.constant 0 : index
    %c1_70 = arith.constant 1 : index
    %c4_71 = arith.constant 4 : index
    %c0_72 = arith.constant 0 : index
    %c0_73 = arith.constant 0 : index
    %17 = vector.load %arg1[%c0_69, %c1_70, %c4_71, %c0_72, %c0_73] : memref<1x5x8x16x8xf32, #tpu.memory_space<vmem>>, vector<1x1x1x1x8xf32>
    %c0_74 = arith.constant 0 : index
    %c1_75 = arith.constant 1 : index
    %c3_76 = arith.constant 3 : index
    %c0_77 = arith.constant 0 : index
    %c0_78 = arith.constant 0 : index
    %18 = vector.load %arg1[%c0_74, %c1_75, %c3_76, %c0_77, %c0_78] : memref<1x5x8x16x8xf32, #tpu.memory_space<vmem>>, vector<1x1x1x1x8xf32>
    %c0_79 = arith.constant 0 : index
    %c1_80 = arith.constant 1 : index
    %c2_81 = arith.constant 2 : index
    %c0_82 = arith.constant 0 : index
    %c0_83 = arith.constant 0 : index
    %19 = vector.load %arg1[%c0_79, %c1_80, %c2_81, %c0_82, %c0_83] : memref<1x5x8x16x8xf32, #tpu.memory_space<vmem>>, vector<1x1x1x1x8xf32>
    %c0_84 = arith.constant 0 : index
    %c1_85 = arith.constant 1 : index
    %c1_86 = arith.constant 1 : index
    %c0_87 = arith.constant 0 : index
    %c0_88 = arith.constant 0 : index
    %20 = vector.load %arg1[%c0_84, %c1_85, %c1_86, %c0_87, %c0_88] : memref<1x5x8x16x8xf32, #tpu.memory_space<vmem>>, vector<1x1x1x1x8xf32>
    %21 = tpu.concatenate %14, %15, %16, %17, %18, %19, %20 in 3 : vector<1x1x1x1x8xf32>, vector<1x1x1x1x8xf32>, vector<1x1x1x1x8xf32>, vector<1x1x1x1x8xf32>, vector<1x1x1x1x8xf32>, vector<1x1x1x1x8xf32>, vector<1x1x1x1x8xf32> -> vector<1x1x1x7x8xf32>
    %c0_89 = arith.constant 0 : index
    %c0_90 = arith.constant 0 : index
    %c9_91 = arith.constant 9 : index
    %c2_92 = arith.constant 2 : index
    %c0_93 = arith.constant 0 : index
    %22 = vector.load %arg2[%c0_89, %c0_90, %c9_91, %c2_92, %c0_93] : memref<1x5x10x18x8xf32, #tpu.memory_space<vmem>>, vector<1x1x1x7x8xf32>
    tpu.vector_store %arg2[%c0_89, %c0_90, %c9_91, %c2_92, %c0_93], %21 {strides = array<i32>} : memref<1x5x10x18x8xf32, #tpu.memory_space<vmem>>, vector<1x1x1x7x8xf32>,
    %c0_94 = arith.constant 0 : index
    %c1_95 = arith.constant 1 : index
    %c0_96 = arith.constant 0 : index
    %c0_97 = arith.constant 0 : index
    %c0_98 = arith.constant 0 : index
    %23 = vector.load %arg1[%c0_94, %c1_95, %c0_96, %c0_97, %c0_98] : memref<1x5x8x16x8xf32, #tpu.memory_space<vmem>>, vector<1x1x1x8x8xf32>
    %c0_99 = arith.constant 0 : index
    %c0_100 = arith.constant 0 : index
    %c9_101 = arith.constant 9 : index
    %c9_102 = arith.constant 9 : index
    %c0_103 = arith.constant 0 : index
    %24 = vector.load %arg2[%c0_99, %c0_100, %c9_101, %c9_102, %c0_103] : memref<1x5x10x18x8xf32, #tpu.memory_space<vmem>>, vector<1x1x1x8x8xf32>
    tpu.vector_store %arg2[%c0_99, %c0_100, %c9_101, %c9_102, %c0_103], %23 {strides = array<i32>} : memref<1x5x10x18x8xf32, #tpu.memory_space<vmem>>, vector<1x1x1x8x8xf32>,
    %c0_104 = arith.constant 0 : index
    %c4_105 = arith.constant 4 : index
    %c7_106 = arith.constant 7 : index
    %c7_107 = arith.constant 7 : index
    %c0_108 = arith.constant 0 : index
    %25 = vector.load %arg1[%c0_104, %c4_105, %c7_106, %c7_107, %c0_108] : memref<1x5x8x16x8xf32, #tpu.memory_space<vmem>>, vector<1x1x1x1x8xf32>
    %c0_109 = arith.constant 0 : index
    %c4_110 = arith.constant 4 : index
    %c7_111 = arith.constant 7 : index
    %c6_112 = arith.constant 6 : index
    %c0_113 = arith.constant 0 : index
    %26 = vector.load %arg1[%c0_109, %c4_110, %c7_111, %c6_112, %c0_113] : memref<1x5x8x16x8xf32, #tpu.memory_space<vmem>>, vector<1x1x1x1x8xf32>
    %c0_114 = arith.constant 0 : index
    %c4_115 = arith.constant 4 : index
    %c7_116 = arith.constant 7 : index
    %c5_117 = arith.constant 5 : index
    %c0_118 = arith.constant 0 : index
    %27 = vector.load %arg1[%c0_114, %c4_115, %c7_116, %c5_117, %c0_118] : memref<1x5x8x16x8xf32, #tpu.memory_space<vmem>>, vector<1x1x1x1x8xf32>
    %c0_119 = arith.constant 0 : index
    %c4_120 = arith.constant 4 : index
    %c7_121 = arith.constant 7 : index
    %c4_122 = arith.constant 4 : index
    %c0_123 = arith.constant 0 : index
    %28 = vector.load %arg1[%c0_119, %c4_120, %c7_121, %c4_122, %c0_123] : memref<1x5x8x16x8xf32, #tpu.memory_space<vmem>>, vector<1x1x1x1x8xf32>
    %c0_124 = arith.constant 0 : index
    %c4_125 = arith.constant 4 : index
    %c7_126 = arith.constant 7 : index
    %c3_127 = arith.constant 3 : index
    %c0_128 = arith.constant 0 : index
    %29 = vector.load %arg1[%c0_124, %c4_125, %c7_126, %c3_127, %c0_128] : memref<1x5x8x16x8xf32, #tpu.memory_space<vmem>>, vector<1x1x1x1x8xf32>
    %c0_129 = arith.constant 0 : index
    %c4_130 = arith.constant 4 : index
    %c7_131 = arith.constant 7 : index
    %c2_132 = arith.constant 2 : index
    %c0_133 = arith.constant 0 : index
    %30 = vector.load %arg1[%c0_129, %c4_130, %c7_131, %c2_132, %c0_133] : memref<1x5x8x16x8xf32, #tpu.memory_space<vmem>>, vector<1x1x1x1x8xf32>
    %c0_134 = arith.constant 0 : index
    %c4_135 = arith.constant 4 : index
    %c7_136 = arith.constant 7 : index
    %c1_137 = arith.constant 1 : index
    %c0_138 = arith.constant 0 : index
    %31 = vector.load %arg1[%c0_134, %c4_135, %c7_136, %c1_137, %c0_138] : memref<1x5x8x16x8xf32, #tpu.memory_space<vmem>>, vector<1x1x1x1x8xf32>
    %c0_139 = arith.constant 0 : index
    %c4_140 = arith.constant 4 : index
    %c7_141 = arith.constant 7 : index
    %c0_142 = arith.constant 0 : index
    %c0_143 = arith.constant 0 : index
    %32 = vector.load %arg1[%c0_139, %c4_140, %c7_141, %c0_142, %c0_143] : memref<1x5x8x16x8xf32, #tpu.memory_space<vmem>>, vector<1x1x1x1x8xf32>
    %33 = tpu.concatenate %25, %26, %27, %28, %29, %30, %31, %32 in 2 : vector<1x1x1x1x8xf32>, vector<1x1x1x1x8xf32>, vector<1x1x1x1x8xf32>, vector<1x1x1x1x8xf32>, vector<1x1x1x1x8xf32>, vector<1x1x1x1x8xf32>, vector<1x1x1x1x8xf32>, vector<1x1x1x1x8xf32> -> vector<1x1x8x1x8xf32>
    %c0_144 = arith.constant 0 : index
    %c0_145 = arith.constant 0 : index
    %c1_146 = arith.constant 1 : index
    %c0_147 = arith.constant 0 : index
    %c0_148 = arith.constant 0 : index
    %34 = vector.load %arg2[%c0_144, %c0_145, %c1_146, %c0_147, %c0_148] : memref<1x5x10x18x8xf32, #tpu.memory_space<vmem>>, vector<1x1x8x1x8xf32>
    tpu.vector_store %arg2[%c0_144, %c0_145, %c1_146, %c0_147, %c0_148], %33 {strides = array<i32>} : memref<1x5x10x18x8xf32, #tpu.memory_space<vmem>>, vector<1x1x8x1x8xf32>,
    %c0_149 = arith.constant 0 : index
    %c1_150 = arith.constant 1 : index
    %c0_151 = arith.constant 0 : index
    %c15_152 = arith.constant 15 : index
    %c0_153 = arith.constant 0 : index
    %35 = vector.load %arg1[%c0_149, %c1_150, %c0_151, %c15_152, %c0_153] : memref<1x5x8x16x8xf32, #tpu.memory_space<vmem>>, vector<1x1x1x1x8xf32>
    %c0_154 = arith.constant 0 : index
    %c1_155 = arith.constant 1 : index
    %c0_156 = arith.constant 0 : index
    %c14 = arith.constant 14 : index
    %c0_157 = arith.constant 0 : index
    %36 = vector.load %arg1[%c0_154, %c1_155, %c0_156, %c14, %c0_157] : memref<1x5x8x16x8xf32, #tpu.memory_space<vmem>>, vector<1x1x1x1x8xf32>
    %c0_158 = arith.constant 0 : index
    %c1_159 = arith.constant 1 : index
    %c0_160 = arith.constant 0 : index
    %c13 = arith.constant 13 : index
    %c0_161 = arith.constant 0 : index
    %37 = vector.load %arg1[%c0_158, %c1_159, %c0_160, %c13, %c0_161] : memref<1x5x8x16x8xf32, #tpu.memory_space<vmem>>, vector<1x1x1x1x8xf32>
    %c0_162 = arith.constant 0 : index
    %c1_163 = arith.constant 1 : index
    %c0_164 = arith.constant 0 : index
    %c12 = arith.constant 12 : index
    %c0_165 = arith.constant 0 : index
    %38 = vector.load %arg1[%c0_162, %c1_163, %c0_164, %c12, %c0_165] : memref<1x5x8x16x8xf32, #tpu.memory_space<vmem>>, vector<1x1x1x1x8xf32>
    %c0_166 = arith.constant 0 : index
    %c1_167 = arith.constant 1 : index
    %c0_168 = arith.constant 0 : index
    %c11 = arith.constant 11 : index
    %c0_169 = arith.constant 0 : index
    %39 = vector.load %arg1[%c0_166, %c1_167, %c0_168, %c11, %c0_169] : memref<1x5x8x16x8xf32, #tpu.memory_space<vmem>>, vector<1x1x1x1x8xf32>
    %c0_170 = arith.constant 0 : index
    %c1_171 = arith.constant 1 : index
    %c0_172 = arith.constant 0 : index
    %c10 = arith.constant 10 : index
    %c0_173 = arith.constant 0 : index
    %40 = vector.load %arg1[%c0_170, %c1_171, %c0_172, %c10, %c0_173] : memref<1x5x8x16x8xf32, #tpu.memory_space<vmem>>, vector<1x1x1x1x8xf32>
    %c0_174 = arith.constant 0 : index
    %c1_175 = arith.constant 1 : index
    %c0_176 = arith.constant 0 : index
    %c9_177 = arith.constant 9 : index
    %c0_178 = arith.constant 0 : index
    %41 = vector.load %arg1[%c0_174, %c1_175, %c0_176, %c9_177, %c0_178] : memref<1x5x8x16x8xf32, #tpu.memory_space<vmem>>, vector<1x1x1x1x8xf32>
    %c0_179 = arith.constant 0 : index
    %c1_180 = arith.constant 1 : index
    %c0_181 = arith.constant 0 : index
    %c8_182 = arith.constant 8 : index
    %c0_183 = arith.constant 0 : index
    %42 = vector.load %arg1[%c0_179, %c1_180, %c0_181, %c8_182, %c0_183] : memref<1x5x8x16x8xf32, #tpu.memory_space<vmem>>, vector<1x1x1x1x8xf32>
    %43 = tpu.concatenate %35, %36, %37, %38, %39, %40, %41, %42 in 2 : vector<1x1x1x1x8xf32>, vector<1x1x1x1x8xf32>, vector<1x1x1x1x8xf32>, vector<1x1x1x1x8xf32>, vector<1x1x1x1x8xf32>, vector<1x1x1x1x8xf32>, vector<1x1x1x1x8xf32>, vector<1x1x1x1x8xf32> -> vector<1x1x8x1x8xf32>
    %c0_184 = arith.constant 0 : index
    %c0_185 = arith.constant 0 : index
    %c2_186 = arith.constant 2 : index
    %c17 = arith.constant 17 : index
    %c0_187 = arith.constant 0 : index
    %44 = vector.load %arg2[%c0_184, %c0_185, %c2_186, %c17, %c0_187] : memref<1x5x10x18x8xf32, #tpu.memory_space<vmem>>, vector<1x1x8x1x8xf32>
    tpu.vector_store %arg2[%c0_184, %c0_185, %c2_186, %c17, %c0_187], %43 {strides = array<i32>} : memref<1x5x10x18x8xf32, #tpu.memory_space<vmem>>, vector<1x1x8x1x8xf32>,
    %c0_188 = arith.constant 0 : index
    %c0_189 = arith.constant 0 : index
    %c7_190 = arith.constant 7 : index
    %c8_191 = arith.constant 8 : index
    %c0_192 = arith.constant 0 : index
    %45 = vector.load %arg1[%c0_188, %c0_189, %c7_190, %c8_191, %c0_192] : memref<1x5x8x16x8xf32, #tpu.memory_space<vmem>>, vector<1x1x1x8x8xf32>
    %c0_193 = arith.constant 0 : index
    %c1_194 = arith.constant 1 : index
    %c0_195 = arith.constant 0 : index
    %c1_196 = arith.constant 1 : index
    %c0_197 = arith.constant 0 : index
    %46 = vector.load %arg2[%c0_193, %c1_194, %c0_195, %c1_196, %c0_197] : memref<1x5x10x18x8xf32, #tpu.memory_space<vmem>>, vector<1x1x1x8x8xf32>
    tpu.vector_store %arg2[%c0_193, %c1_194, %c0_195, %c1_196, %c0_197], %45 {strides = array<i32>} : memref<1x5x10x18x8xf32, #tpu.memory_space<vmem>>, vector<1x1x1x8x8xf32>,
    %c0_198 = arith.constant 0 : index
    %c0_199 = arith.constant 0 : index
    %c7_200 = arith.constant 7 : index
    %c15_201 = arith.constant 15 : index
    %c0_202 = arith.constant 0 : index
    %47 = vector.load %arg1[%c0_198, %c0_199, %c7_200, %c15_201, %c0_202] : memref<1x5x8x16x8xf32, #tpu.memory_space<vmem>>, vector<1x1x1x1x8xf32>
    %c0_203 = arith.constant 0 : index
    %c0_204 = arith.constant 0 : index
    %c6_205 = arith.constant 6 : index
    %c15_206 = arith.constant 15 : index
    %c0_207 = arith.constant 0 : index
    %48 = vector.load %arg1[%c0_203, %c0_204, %c6_205, %c15_206, %c0_207] : memref<1x5x8x16x8xf32, #tpu.memory_space<vmem>>, vector<1x1x1x1x8xf32>
    %c0_208 = arith.constant 0 : index
    %c0_209 = arith.constant 0 : index
    %c5_210 = arith.constant 5 : index
    %c15_211 = arith.constant 15 : index
    %c0_212 = arith.constant 0 : index
    %49 = vector.load %arg1[%c0_208, %c0_209, %c5_210, %c15_211, %c0_212] : memref<1x5x8x16x8xf32, #tpu.memory_space<vmem>>, vector<1x1x1x1x8xf32>
    %c0_213 = arith.constant 0 : index
    %c0_214 = arith.constant 0 : index
    %c4_215 = arith.constant 4 : index
    %c15_216 = arith.constant 15 : index
    %c0_217 = arith.constant 0 : index
    %50 = vector.load %arg1[%c0_213, %c0_214, %c4_215, %c15_216, %c0_217] : memref<1x5x8x16x8xf32, #tpu.memory_space<vmem>>, vector<1x1x1x1x8xf32>
    %c0_218 = arith.constant 0 : index
    %c0_219 = arith.constant 0 : index
    %c3_220 = arith.constant 3 : index
    %c15_221 = arith.constant 15 : index
    %c0_222 = arith.constant 0 : index
    %51 = vector.load %arg1[%c0_218, %c0_219, %c3_220, %c15_221, %c0_222] : memref<1x5x8x16x8xf32, #tpu.memory_space<vmem>>, vector<1x1x1x1x8xf32>
    %c0_223 = arith.constant 0 : index
    %c0_224 = arith.constant 0 : index
    %c2_225 = arith.constant 2 : index
    %c15_226 = arith.constant 15 : index
    %c0_227 = arith.constant 0 : index
    %52 = vector.load %arg1[%c0_223, %c0_224, %c2_225, %c15_226, %c0_227] : memref<1x5x8x16x8xf32, #tpu.memory_space<vmem>>, vector<1x1x1x1x8xf32>
    %c0_228 = arith.constant 0 : index
    %c0_229 = arith.constant 0 : index
    %c1_230 = arith.constant 1 : index
    %c15_231 = arith.constant 15 : index
    %c0_232 = arith.constant 0 : index
    %53 = vector.load %arg1[%c0_228, %c0_229, %c1_230, %c15_231, %c0_232] : memref<1x5x8x16x8xf32, #tpu.memory_space<vmem>>, vector<1x1x1x1x8xf32>
    %c0_233 = arith.constant 0 : index
    %c0_234 = arith.constant 0 : index
    %c0_235 = arith.constant 0 : index
    %c15_236 = arith.constant 15 : index
    %c0_237 = arith.constant 0 : index
    %54 = vector.load %arg1[%c0_233, %c0_234, %c0_235, %c15_236, %c0_237] : memref<1x5x8x16x8xf32, #tpu.memory_space<vmem>>, vector<1x1x1x1x8xf32>
    %55 = tpu.concatenate %47, %48, %49, %50, %51, %52, %53, %54 in 3 : vector<1x1x1x1x8xf32>, vector<1x1x1x1x8xf32>, vector<1x1x1x1x8xf32>, vector<1x1x1x1x8xf32>, vector<1x1x1x1x8xf32>, vector<1x1x1x1x8xf32>, vector<1x1x1x1x8xf32>, vector<1x1x1x1x8xf32> -> vector<1x1x1x8x8xf32>
    %c0_238 = arith.constant 0 : index
    %c1_239 = arith.constant 1 : index
    %c0_240 = arith.constant 0 : index
    %c9_241 = arith.constant 9 : index
    %c0_242 = arith.constant 0 : index
    %56 = vector.load %arg2[%c0_238, %c1_239, %c0_240, %c9_241, %c0_242] : memref<1x5x10x18x8xf32, #tpu.memory_space<vmem>>, vector<1x1x1x8x8xf32>
    tpu.vector_store %arg2[%c0_238, %c1_239, %c0_240, %c9_241, %c0_242], %55 {strides = array<i32>} : memref<1x5x10x18x8xf32, #tpu.memory_space<vmem>>, vector<1x1x1x8x8xf32>,
    %c0_243 = arith.constant 0 : index
    %c2_244 = arith.constant 2 : index
    %c7_245 = arith.constant 7 : index
    %c0_246 = arith.constant 0 : index
    %c0_247 = arith.constant 0 : index
    %57 = vector.load %arg1[%c0_243, %c2_244, %c7_245, %c0_246, %c0_247] : memref<1x5x8x16x8xf32, #tpu.memory_space<vmem>>, vector<1x1x1x1x8xf32>
    %c0_248 = arith.constant 0 : index
    %c2_249 = arith.constant 2 : index
    %c6_250 = arith.constant 6 : index
    %c0_251 = arith.constant 0 : index
    %c0_252 = arith.constant 0 : index
    %58 = vector.load %arg1[%c0_248, %c2_249, %c6_250, %c0_251, %c0_252] : memref<1x5x8x16x8xf32, #tpu.memory_space<vmem>>, vector<1x1x1x1x8xf32>
    %c0_253 = arith.constant 0 : index
    %c2_254 = arith.constant 2 : index
    %c5_255 = arith.constant 5 : index
    %c0_256 = arith.constant 0 : index
    %c0_257 = arith.constant 0 : index
    %59 = vector.load %arg1[%c0_253, %c2_254, %c5_255, %c0_256, %c0_257] : memref<1x5x8x16x8xf32, #tpu.memory_space<vmem>>, vector<1x1x1x1x8xf32>
    %c0_258 = arith.constant 0 : index
    %c2_259 = arith.constant 2 : index
    %c4_260 = arith.constant 4 : index
    %c0_261 = arith.constant 0 : index
    %c0_262 = arith.constant 0 : index
    %60 = vector.load %arg1[%c0_258, %c2_259, %c4_260, %c0_261, %c0_262] : memref<1x5x8x16x8xf32, #tpu.memory_space<vmem>>, vector<1x1x1x1x8xf32>
    %c0_263 = arith.constant 0 : index
    %c2_264 = arith.constant 2 : index
    %c3_265 = arith.constant 3 : index
    %c0_266 = arith.constant 0 : index
    %c0_267 = arith.constant 0 : index
    %61 = vector.load %arg1[%c0_263, %c2_264, %c3_265, %c0_266, %c0_267] : memref<1x5x8x16x8xf32, #tpu.memory_space<vmem>>, vector<1x1x1x1x8xf32>
    %c0_268 = arith.constant 0 : index
    %c2_269 = arith.constant 2 : index
    %c2_270 = arith.constant 2 : index
    %c0_271 = arith.constant 0 : index
    %c0_272 = arith.constant 0 : index
    %62 = vector.load %arg1[%c0_268, %c2_269, %c2_270, %c0_271, %c0_272] : memref<1x5x8x16x8xf32, #tpu.memory_space<vmem>>, vector<1x1x1x1x8xf32>
    %c0_273 = arith.constant 0 : index
    %c2_274 = arith.constant 2 : index
    %c1_275 = arith.constant 1 : index
    %c0_276 = arith.constant 0 : index
    %c0_277 = arith.constant 0 : index
    %63 = vector.load %arg1[%c0_273, %c2_274, %c1_275, %c0_276, %c0_277] : memref<1x5x8x16x8xf32, #tpu.memory_space<vmem>>, vector<1x1x1x1x8xf32>
    %64 = tpu.concatenate %57, %58, %59, %60, %61, %62, %63 in 3 : vector<1x1x1x1x8xf32>, vector<1x1x1x1x8xf32>, vector<1x1x1x1x8xf32>, vector<1x1x1x1x8xf32>, vector<1x1x1x1x8xf32>, vector<1x1x1x1x8xf32>, vector<1x1x1x1x8xf32> -> vector<1x1x1x7x8xf32>
    %c0_278 = arith.constant 0 : index
    %c1_279 = arith.constant 1 : index
    %c9_280 = arith.constant 9 : index
    %c2_281 = arith.constant 2 : index
    %c0_282 = arith.constant 0 : index
    %65 = vector.load %arg2[%c0_278, %c1_279, %c9_280, %c2_281, %c0_282] : memref<1x5x10x18x8xf32, #tpu.memory_space<vmem>>, vector<1x1x1x7x8xf32>
    tpu.vector_store %arg2[%c0_278, %c1_279, %c9_280, %c2_281, %c0_282], %64 {strides = array<i32>} : memref<1x5x10x18x8xf32, #tpu.memory_space<vmem>>, vector<1x1x1x7x8xf32>,
    %c0_283 = arith.constant 0 : index
    %c2_284 = arith.constant 2 : index
    %c0_285 = arith.constant 0 : index
    %c0_286 = arith.constant 0 : index
    %c0_287 = arith.constant 0 : index
    %66 = vector.load %arg1[%c0_283, %c2_284, %c0_285, %c0_286, %c0_287] : memref<1x5x8x16x8xf32, #tpu.memory_space<vmem>>, vector<1x1x1x8x8xf32>
    %c0_288 = arith.constant 0 : index
    %c1_289 = arith.constant 1 : index
    %c9_290 = arith.constant 9 : index
    %c9_291 = arith.constant 9 : index
    %c0_292 = arith.constant 0 : index
    %67 = vector.load %arg2[%c0_288, %c1_289, %c9_290, %c9_291, %c0_292] : memref<1x5x10x18x8xf32, #tpu.memory_space<vmem>>, vector<1x1x1x8x8xf32>
    tpu.vector_store %arg2[%c0_288, %c1_289, %c9_290, %c9_291, %c0_292], %66 {strides = array<i32>} : memref<1x5x10x18x8xf32, #tpu.memory_space<vmem>>, vector<1x1x1x8x8xf32>,
    %c0_293 = arith.constant 0 : index
    %c0_294 = arith.constant 0 : index
    %c7_295 = arith.constant 7 : index
    %c7_296 = arith.constant 7 : index
    %c0_297 = arith.constant 0 : index
    %68 = vector.load %arg1[%c0_293, %c0_294, %c7_295, %c7_296, %c0_297] : memref<1x5x8x16x8xf32, #tpu.memory_space<vmem>>, vector<1x1x1x1x8xf32>
    %c0_298 = arith.constant 0 : index
    %c0_299 = arith.constant 0 : index
    %c7_300 = arith.constant 7 : index
    %c6_301 = arith.constant 6 : index
    %c0_302 = arith.constant 0 : index
    %69 = vector.load %arg1[%c0_298, %c0_299, %c7_300, %c6_301, %c0_302] : memref<1x5x8x16x8xf32, #tpu.memory_space<vmem>>, vector<1x1x1x1x8xf32>
    %c0_303 = arith.constant 0 : index
    %c0_304 = arith.constant 0 : index
    %c7_305 = arith.constant 7 : index
    %c5_306 = arith.constant 5 : index
    %c0_307 = arith.constant 0 : index
    %70 = vector.load %arg1[%c0_303, %c0_304, %c7_305, %c5_306, %c0_307] : memref<1x5x8x16x8xf32, #tpu.memory_space<vmem>>, vector<1x1x1x1x8xf32>
    %c0_308 = arith.constant 0 : index
    %c0_309 = arith.constant 0 : index
    %c7_310 = arith.constant 7 : index
    %c4_311 = arith.constant 4 : index
    %c0_312 = arith.constant 0 : index
    %71 = vector.load %arg1[%c0_308, %c0_309, %c7_310, %c4_311, %c0_312] : memref<1x5x8x16x8xf32, #tpu.memory_space<vmem>>, vector<1x1x1x1x8xf32>
    %c0_313 = arith.constant 0 : index
    %c0_314 = arith.constant 0 : index
    %c7_315 = arith.constant 7 : index
    %c3_316 = arith.constant 3 : index
    %c0_317 = arith.constant 0 : index
    %72 = vector.load %arg1[%c0_313, %c0_314, %c7_315, %c3_316, %c0_317] : memref<1x5x8x16x8xf32, #tpu.memory_space<vmem>>, vector<1x1x1x1x8xf32>
    %c0_318 = arith.constant 0 : index
    %c0_319 = arith.constant 0 : index
    %c7_320 = arith.constant 7 : index
    %c2_321 = arith.constant 2 : index
    %c0_322 = arith.constant 0 : index
    %73 = vector.load %arg1[%c0_318, %c0_319, %c7_320, %c2_321, %c0_322] : memref<1x5x8x16x8xf32, #tpu.memory_space<vmem>>, vector<1x1x1x1x8xf32>
    %c0_323 = arith.constant 0 : index
    %c0_324 = arith.constant 0 : index
    %c7_325 = arith.constant 7 : index
    %c1_326 = arith.constant 1 : index
    %c0_327 = arith.constant 0 : index
    %74 = vector.load %arg1[%c0_323, %c0_324, %c7_325, %c1_326, %c0_327] : memref<1x5x8x16x8xf32, #tpu.memory_space<vmem>>, vector<1x1x1x1x8xf32>
    %c0_328 = arith.constant 0 : index
    %c0_329 = arith.constant 0 : index
    %c7_330 = arith.constant 7 : index
    %c0_331 = arith.constant 0 : index
    %c0_332 = arith.constant 0 : index
    %75 = vector.load %arg1[%c0_328, %c0_329, %c7_330, %c0_331, %c0_332] : memref<1x5x8x16x8xf32, #tpu.memory_space<vmem>>, vector<1x1x1x1x8xf32>
    %76 = tpu.concatenate %68, %69, %70, %71, %72, %73, %74, %75 in 2 : vector<1x1x1x1x8xf32>, vector<1x1x1x1x8xf32>, vector<1x1x1x1x8xf32>, vector<1x1x1x1x8xf32>, vector<1x1x1x1x8xf32>, vector<1x1x1x1x8xf32>, vector<1x1x1x1x8xf32>, vector<1x1x1x1x8xf32> -> vector<1x1x8x1x8xf32>
    %c0_333 = arith.constant 0 : index
    %c1_334 = arith.constant 1 : index
    %c1_335 = arith.constant 1 : index
    %c0_336 = arith.constant 0 : index
    %c0_337 = arith.constant 0 : index
    %77 = vector.load %arg2[%c0_333, %c1_334, %c1_335, %c0_336, %c0_337] : memref<1x5x10x18x8xf32, #tpu.memory_space<vmem>>, vector<1x1x8x1x8xf32>
    tpu.vector_store %arg2[%c0_333, %c1_334, %c1_335, %c0_336, %c0_337], %76 {strides = array<i32>} : memref<1x5x10x18x8xf32, #tpu.memory_space<vmem>>, vector<1x1x8x1x8xf32>,
    %c0_338 = arith.constant 0 : index
    %c2_339 = arith.constant 2 : index
    %c0_340 = arith.constant 0 : index
    %c15_341 = arith.constant 15 : index
    %c0_342 = arith.constant 0 : index
    %78 = vector.load %arg1[%c0_338, %c2_339, %c0_340, %c15_341, %c0_342] : memref<1x5x8x16x8xf32, #tpu.memory_space<vmem>>, vector<1x1x1x1x8xf32>
    %c0_343 = arith.constant 0 : index
    %c2_344 = arith.constant 2 : index
    %c0_345 = arith.constant 0 : index
    %c14_346 = arith.constant 14 : index
    %c0_347 = arith.constant 0 : index
    %79 = vector.load %arg1[%c0_343, %c2_344, %c0_345, %c14_346, %c0_347] : memref<1x5x8x16x8xf32, #tpu.memory_space<vmem>>, vector<1x1x1x1x8xf32>
    %c0_348 = arith.constant 0 : index
    %c2_349 = arith.constant 2 : index
    %c0_350 = arith.constant 0 : index
    %c13_351 = arith.constant 13 : index
    %c0_352 = arith.constant 0 : index
    %80 = vector.load %arg1[%c0_348, %c2_349, %c0_350, %c13_351, %c0_352] : memref<1x5x8x16x8xf32, #tpu.memory_space<vmem>>, vector<1x1x1x1x8xf32>
    %c0_353 = arith.constant 0 : index
    %c2_354 = arith.constant 2 : index
    %c0_355 = arith.constant 0 : index
    %c12_356 = arith.constant 12 : index
    %c0_357 = arith.constant 0 : index
    %81 = vector.load %arg1[%c0_353, %c2_354, %c0_355, %c12_356, %c0_357] : memref<1x5x8x16x8xf32, #tpu.memory_space<vmem>>, vector<1x1x1x1x8xf32>
    %c0_358 = arith.constant 0 : index
    %c2_359 = arith.constant 2 : index
    %c0_360 = arith.constant 0 : index
    %c11_361 = arith.constant 11 : index
    %c0_362 = arith.constant 0 : index
    %82 = vector.load %arg1[%c0_358, %c2_359, %c0_360, %c11_361, %c0_362] : memref<1x5x8x16x8xf32, #tpu.memory_space<vmem>>, vector<1x1x1x1x8xf32>
    %c0_363 = arith.constant 0 : index
    %c2_364 = arith.constant 2 : index
    %c0_365 = arith.constant 0 : index
    %c10_366 = arith.constant 10 : index
    %c0_367 = arith.constant 0 : index
    %83 = vector.load %arg1[%c0_363, %c2_364, %c0_365, %c10_366, %c0_367] : memref<1x5x8x16x8xf32, #tpu.memory_space<vmem>>, vector<1x1x1x1x8xf32>
    %c0_368 = arith.constant 0 : index
    %c2_369 = arith.constant 2 : index
    %c0_370 = arith.constant 0 : index
    %c9_371 = arith.constant 9 : index
    %c0_372 = arith.constant 0 : index
    %84 = vector.load %arg1[%c0_368, %c2_369, %c0_370, %c9_371, %c0_372] : memref<1x5x8x16x8xf32, #tpu.memory_space<vmem>>, vector<1x1x1x1x8xf32>
    %c0_373 = arith.constant 0 : index
    %c2_374 = arith.constant 2 : index
    %c0_375 = arith.constant 0 : index
    %c8_376 = arith.constant 8 : index
    %c0_377 = arith.constant 0 : index
    %85 = vector.load %arg1[%c0_373, %c2_374, %c0_375, %c8_376, %c0_377] : memref<1x5x8x16x8xf32, #tpu.memory_space<vmem>>, vector<1x1x1x1x8xf32>
    %86 = tpu.concatenate %78, %79, %80, %81, %82, %83, %84, %85 in 2 : vector<1x1x1x1x8xf32>, vector<1x1x1x1x8xf32>, vector<1x1x1x1x8xf32>, vector<1x1x1x1x8xf32>, vector<1x1x1x1x8xf32>, vector<1x1x1x1x8xf32>, vector<1x1x1x1x8xf32>, vector<1x1x1x1x8xf32> -> vector<1x1x8x1x8xf32>
    %c0_378 = arith.constant 0 : index
    %c1_379 = arith.constant 1 : index
    %c2_380 = arith.constant 2 : index
    %c17_381 = arith.constant 17 : index
    %c0_382 = arith.constant 0 : index
    %87 = vector.load %arg2[%c0_378, %c1_379, %c2_380, %c17_381, %c0_382] : memref<1x5x10x18x8xf32, #tpu.memory_space<vmem>>, vector<1x1x8x1x8xf32>
    tpu.vector_store %arg2[%c0_378, %c1_379, %c2_380, %c17_381, %c0_382], %86 {strides = array<i32>} : memref<1x5x10x18x8xf32, #tpu.memory_space<vmem>>, vector<1x1x8x1x8xf32>,
    %c0_383 = arith.constant 0 : index
    %c1_384 = arith.constant 1 : index
    %c7_385 = arith.constant 7 : index
    %c8_386 = arith.constant 8 : index
    %c0_387 = arith.constant 0 : index
    %88 = vector.load %arg1[%c0_383, %c1_384, %c7_385, %c8_386, %c0_387] : memref<1x5x8x16x8xf32, #tpu.memory_space<vmem>>, vector<1x1x1x8x8xf32>
    %c0_388 = arith.constant 0 : index
    %c2_389 = arith.constant 2 : index
    %c0_390 = arith.constant 0 : index
    %c1_391 = arith.constant 1 : index
    %c0_392 = arith.constant 0 : index
    %89 = vector.load %arg2[%c0_388, %c2_389, %c0_390, %c1_391, %c0_392] : memref<1x5x10x18x8xf32, #tpu.memory_space<vmem>>, vector<1x1x1x8x8xf32>
    tpu.vector_store %arg2[%c0_388, %c2_389, %c0_390, %c1_391, %c0_392], %88 {strides = array<i32>} : memref<1x5x10x18x8xf32, #tpu.memory_space<vmem>>, vector<1x1x1x8x8xf32>,
    %c0_393 = arith.constant 0 : index
    %c1_394 = arith.constant 1 : index
    %c7_395 = arith.constant 7 : index
    %c15_396 = arith.constant 15 : index
    %c0_397 = arith.constant 0 : index
    %90 = vector.load %arg1[%c0_393, %c1_394, %c7_395, %c15_396, %c0_397] : memref<1x5x8x16x8xf32, #tpu.memory_space<vmem>>, vector<1x1x1x1x8xf32>
    %c0_398 = arith.constant 0 : index
    %c1_399 = arith.constant 1 : index
    %c6_400 = arith.constant 6 : index
    %c15_401 = arith.constant 15 : index
    %c0_402 = arith.constant 0 : index
    %91 = vector.load %arg1[%c0_398, %c1_399, %c6_400, %c15_401, %c0_402] : memref<1x5x8x16x8xf32, #tpu.memory_space<vmem>>, vector<1x1x1x1x8xf32>
    %c0_403 = arith.constant 0 : index
    %c1_404 = arith.constant 1 : index
    %c5_405 = arith.constant 5 : index
    %c15_406 = arith.constant 15 : index
    %c0_407 = arith.constant 0 : index
    %92 = vector.load %arg1[%c0_403, %c1_404, %c5_405, %c15_406, %c0_407] : memref<1x5x8x16x8xf32, #tpu.memory_space<vmem>>, vector<1x1x1x1x8xf32>
    %c0_408 = arith.constant 0 : index
    %c1_409 = arith.constant 1 : index
    %c4_410 = arith.constant 4 : index
    %c15_411 = arith.constant 15 : index
    %c0_412 = arith.constant 0 : index
    %93 = vector.load %arg1[%c0_408, %c1_409, %c4_410, %c15_411, %c0_412] : memref<1x5x8x16x8xf32, #tpu.memory_space<vmem>>, vector<1x1x1x1x8xf32>
    %c0_413 = arith.constant 0 : index
    %c1_414 = arith.constant 1 : index
    %c3_415 = arith.constant 3 : index
    %c15_416 = arith.constant 15 : index
    %c0_417 = arith.constant 0 : index
    %94 = vector.load %arg1[%c0_413, %c1_414, %c3_415, %c15_416, %c0_417] : memref<1x5x8x16x8xf32, #tpu.memory_space<vmem>>, vector<1x1x1x1x8xf32>
    %c0_418 = arith.constant 0 : index
    %c1_419 = arith.constant 1 : index
    %c2_420 = arith.constant 2 : index
    %c15_421 = arith.constant 15 : index
    %c0_422 = arith.constant 0 : index
    %95 = vector.load %arg1[%c0_418, %c1_419, %c2_420, %c15_421, %c0_422] : memref<1x5x8x16x8xf32, #tpu.memory_space<vmem>>, vector<1x1x1x1x8xf32>
    %c0_423 = arith.constant 0 : index
    %c1_424 = arith.constant 1 : index
    %c1_425 = arith.constant 1 : index
    %c15_426 = arith.constant 15 : index
    %c0_427 = arith.constant 0 : index
    %96 = vector.load %arg1[%c0_423, %c1_424, %c1_425, %c15_426, %c0_427] : memref<1x5x8x16x8xf32, #tpu.memory_space<vmem>>, vector<1x1x1x1x8xf32>
    %c0_428 = arith.constant 0 : index
    %c1_429 = arith.constant 1 : index
    %c0_430 = arith.constant 0 : index
    %c15_431 = arith.constant 15 : index
    %c0_432 = arith.constant 0 : index
    %97 = vector.load %arg1[%c0_428, %c1_429, %c0_430, %c15_431, %c0_432] : memref<1x5x8x16x8xf32, #tpu.memory_space<vmem>>, vector<1x1x1x1x8xf32>
    %98 = tpu.concatenate %90, %91, %92, %93, %94, %95, %96, %97 in 3 : vector<1x1x1x1x8xf32>, vector<1x1x1x1x8xf32>, vector<1x1x1x1x8xf32>, vector<1x1x1x1x8xf32>, vector<1x1x1x1x8xf32>, vector<1x1x1x1x8xf32>, vector<1x1x1x1x8xf32>, vector<1x1x1x1x8xf32> -> vector<1x1x1x8x8xf32>
    %c0_433 = arith.constant 0 : index
    %c2_434 = arith.constant 2 : index
    %c0_435 = arith.constant 0 : index
    %c9_436 = arith.constant 9 : index
    %c0_437 = arith.constant 0 : index
    %99 = vector.load %arg2[%c0_433, %c2_434, %c0_435, %c9_436, %c0_437] : memref<1x5x10x18x8xf32, #tpu.memory_space<vmem>>, vector<1x1x1x8x8xf32>
    tpu.vector_store %arg2[%c0_433, %c2_434, %c0_435, %c9_436, %c0_437], %98 {strides = array<i32>} : memref<1x5x10x18x8xf32, #tpu.memory_space<vmem>>, vector<1x1x1x8x8xf32>,
    %c0_438 = arith.constant 0 : index
    %c3_439 = arith.constant 3 : index
    %c7_440 = arith.constant 7 : index
    %c0_441 = arith.constant 0 : index
    %c0_442 = arith.constant 0 : index
    %100 = vector.load %arg1[%c0_438, %c3_439, %c7_440, %c0_441, %c0_442] : memref<1x5x8x16x8xf32, #tpu.memory_space<vmem>>, vector<1x1x1x1x8xf32>
    %c0_443 = arith.constant 0 : index
    %c3_444 = arith.constant 3 : index
    %c6_445 = arith.constant 6 : index
    %c0_446 = arith.constant 0 : index
    %c0_447 = arith.constant 0 : index
    %101 = vector.load %arg1[%c0_443, %c3_444, %c6_445, %c0_446, %c0_447] : memref<1x5x8x16x8xf32, #tpu.memory_space<vmem>>, vector<1x1x1x1x8xf32>
    %c0_448 = arith.constant 0 : index
    %c3_449 = arith.constant 3 : index
    %c5_450 = arith.constant 5 : index
    %c0_451 = arith.constant 0 : index
    %c0_452 = arith.constant 0 : index
    %102 = vector.load %arg1[%c0_448, %c3_449, %c5_450, %c0_451, %c0_452] : memref<1x5x8x16x8xf32, #tpu.memory_space<vmem>>, vector<1x1x1x1x8xf32>
    %c0_453 = arith.constant 0 : index
    %c3_454 = arith.constant 3 : index
    %c4_455 = arith.constant 4 : index
    %c0_456 = arith.constant 0 : index
    %c0_457 = arith.constant 0 : index
    %103 = vector.load %arg1[%c0_453, %c3_454, %c4_455, %c0_456, %c0_457] : memref<1x5x8x16x8xf32, #tpu.memory_space<vmem>>, vector<1x1x1x1x8xf32>
    %c0_458 = arith.constant 0 : index
    %c3_459 = arith.constant 3 : index
    %c3_460 = arith.constant 3 : index
    %c0_461 = arith.constant 0 : index
    %c0_462 = arith.constant 0 : index
    %104 = vector.load %arg1[%c0_458, %c3_459, %c3_460, %c0_461, %c0_462] : memref<1x5x8x16x8xf32, #tpu.memory_space<vmem>>, vector<1x1x1x1x8xf32>
    %c0_463 = arith.constant 0 : index
    %c3_464 = arith.constant 3 : index
    %c2_465 = arith.constant 2 : index
    %c0_466 = arith.constant 0 : index
    %c0_467 = arith.constant 0 : index
    %105 = vector.load %arg1[%c0_463, %c3_464, %c2_465, %c0_466, %c0_467] : memref<1x5x8x16x8xf32, #tpu.memory_space<vmem>>, vector<1x1x1x1x8xf32>
    %c0_468 = arith.constant 0 : index
    %c3_469 = arith.constant 3 : index
    %c1_470 = arith.constant 1 : index
    %c0_471 = arith.constant 0 : index
    %c0_472 = arith.constant 0 : index
    %106 = vector.load %arg1[%c0_468, %c3_469, %c1_470, %c0_471, %c0_472] : memref<1x5x8x16x8xf32, #tpu.memory_space<vmem>>, vector<1x1x1x1x8xf32>
    %107 = tpu.concatenate %100, %101, %102, %103, %104, %105, %106 in 3 : vector<1x1x1x1x8xf32>, vector<1x1x1x1x8xf32>, vector<1x1x1x1x8xf32>, vector<1x1x1x1x8xf32>, vector<1x1x1x1x8xf32>, vector<1x1x1x1x8xf32>, vector<1x1x1x1x8xf32> -> vector<1x1x1x7x8xf32>
    %c0_473 = arith.constant 0 : index
    %c2_474 = arith.constant 2 : index
    %c9_475 = arith.constant 9 : index
    %c2_476 = arith.constant 2 : index
    %c0_477 = arith.constant 0 : index
    %108 = vector.load %arg2[%c0_473, %c2_474, %c9_475, %c2_476, %c0_477] : memref<1x5x10x18x8xf32, #tpu.memory_space<vmem>>, vector<1x1x1x7x8xf32>
    tpu.vector_store %arg2[%c0_473, %c2_474, %c9_475, %c2_476, %c0_477], %107 {strides = array<i32>} : memref<1x5x10x18x8xf32, #tpu.memory_space<vmem>>, vector<1x1x1x7x8xf32>,
    %c0_478 = arith.constant 0 : index
    %c3_479 = arith.constant 3 : index
    %c0_480 = arith.constant 0 : index
    %c0_481 = arith.constant 0 : index
    %c0_482 = arith.constant 0 : index
    %109 = vector.load %arg1[%c0_478, %c3_479, %c0_480, %c0_481, %c0_482] : memref<1x5x8x16x8xf32, #tpu.memory_space<vmem>>, vector<1x1x1x8x8xf32>
    %c0_483 = arith.constant 0 : index
    %c2_484 = arith.constant 2 : index
    %c9_485 = arith.constant 9 : index
    %c9_486 = arith.constant 9 : index
    %c0_487 = arith.constant 0 : index
    %110 = vector.load %arg2[%c0_483, %c2_484, %c9_485, %c9_486, %c0_487] : memref<1x5x10x18x8xf32, #tpu.memory_space<vmem>>, vector<1x1x1x8x8xf32>
    tpu.vector_store %arg2[%c0_483, %c2_484, %c9_485, %c9_486, %c0_487], %109 {strides = array<i32>} : memref<1x5x10x18x8xf32, #tpu.memory_space<vmem>>, vector<1x1x1x8x8xf32>,
    %c0_488 = arith.constant 0 : index
    %c1_489 = arith.constant 1 : index
    %c7_490 = arith.constant 7 : index
    %c7_491 = arith.constant 7 : index
    %c0_492 = arith.constant 0 : index
    %111 = vector.load %arg1[%c0_488, %c1_489, %c7_490, %c7_491, %c0_492] : memref<1x5x8x16x8xf32, #tpu.memory_space<vmem>>, vector<1x1x1x1x8xf32>
    %c0_493 = arith.constant 0 : index
    %c1_494 = arith.constant 1 : index
    %c7_495 = arith.constant 7 : index
    %c6_496 = arith.constant 6 : index
    %c0_497 = arith.constant 0 : index
    %112 = vector.load %arg1[%c0_493, %c1_494, %c7_495, %c6_496, %c0_497] : memref<1x5x8x16x8xf32, #tpu.memory_space<vmem>>, vector<1x1x1x1x8xf32>
    %c0_498 = arith.constant 0 : index
    %c1_499 = arith.constant 1 : index
    %c7_500 = arith.constant 7 : index
    %c5_501 = arith.constant 5 : index
    %c0_502 = arith.constant 0 : index
    %113 = vector.load %arg1[%c0_498, %c1_499, %c7_500, %c5_501, %c0_502] : memref<1x5x8x16x8xf32, #tpu.memory_space<vmem>>, vector<1x1x1x1x8xf32>
    %c0_503 = arith.constant 0 : index
    %c1_504 = arith.constant 1 : index
    %c7_505 = arith.constant 7 : index
    %c4_506 = arith.constant 4 : index
    %c0_507 = arith.constant 0 : index
    %114 = vector.load %arg1[%c0_503, %c1_504, %c7_505, %c4_506, %c0_507] : memref<1x5x8x16x8xf32, #tpu.memory_space<vmem>>, vector<1x1x1x1x8xf32>
    %c0_508 = arith.constant 0 : index
    %c1_509 = arith.constant 1 : index
    %c7_510 = arith.constant 7 : index
    %c3_511 = arith.constant 3 : index
    %c0_512 = arith.constant 0 : index
    %115 = vector.load %arg1[%c0_508, %c1_509, %c7_510, %c3_511, %c0_512] : memref<1x5x8x16x8xf32, #tpu.memory_space<vmem>>, vector<1x1x1x1x8xf32>
    %c0_513 = arith.constant 0 : index
    %c1_514 = arith.constant 1 : index
    %c7_515 = arith.constant 7 : index
    %c2_516 = arith.constant 2 : index
    %c0_517 = arith.constant 0 : index
    %116 = vector.load %arg1[%c0_513, %c1_514, %c7_515, %c2_516, %c0_517] : memref<1x5x8x16x8xf32, #tpu.memory_space<vmem>>, vector<1x1x1x1x8xf32>
    %c0_518 = arith.constant 0 : index
    %c1_519 = arith.constant 1 : index
    %c7_520 = arith.constant 7 : index
    %c1_521 = arith.constant 1 : index
    %c0_522 = arith.constant 0 : index
    %117 = vector.load %arg1[%c0_518, %c1_519, %c7_520, %c1_521, %c0_522] : memref<1x5x8x16x8xf32, #tpu.memory_space<vmem>>, vector<1x1x1x1x8xf32>
    %c0_523 = arith.constant 0 : index
    %c1_524 = arith.constant 1 : index
    %c7_525 = arith.constant 7 : index
    %c0_526 = arith.constant 0 : index
    %c0_527 = arith.constant 0 : index
    %118 = vector.load %arg1[%c0_523, %c1_524, %c7_525, %c0_526, %c0_527] : memref<1x5x8x16x8xf32, #tpu.memory_space<vmem>>, vector<1x1x1x1x8xf32>
    %119 = tpu.concatenate %111, %112, %113, %114, %115, %116, %117, %118 in 2 : vector<1x1x1x1x8xf32>, vector<1x1x1x1x8xf32>, vector<1x1x1x1x8xf32>, vector<1x1x1x1x8xf32>, vector<1x1x1x1x8xf32>, vector<1x1x1x1x8xf32>, vector<1x1x1x1x8xf32>, vector<1x1x1x1x8xf32> -> vector<1x1x8x1x8xf32>
    %c0_528 = arith.constant 0 : index
    %c2_529 = arith.constant 2 : index
    %c1_530 = arith.constant 1 : index
    %c0_531 = arith.constant 0 : index
    %c0_532 = arith.constant 0 : index
    %120 = vector.load %arg2[%c0_528, %c2_529, %c1_530, %c0_531, %c0_532] : memref<1x5x10x18x8xf32, #tpu.memory_space<vmem>>, vector<1x1x8x1x8xf32>
    tpu.vector_store %arg2[%c0_528, %c2_529, %c1_530, %c0_531, %c0_532], %119 {strides = array<i32>} : memref<1x5x10x18x8xf32, #tpu.memory_space<vmem>>, vector<1x1x8x1x8xf32>,
    %c0_533 = arith.constant 0 : index
    %c3_534 = arith.constant 3 : index
    %c0_535 = arith.constant 0 : index
    %c15_536 = arith.constant 15 : index
    %c0_537 = arith.constant 0 : index
    %121 = vector.load %arg1[%c0_533, %c3_534, %c0_535, %c15_536, %c0_537] : memref<1x5x8x16x8xf32, #tpu.memory_space<vmem>>, vector<1x1x1x1x8xf32>
    %c0_538 = arith.constant 0 : index
    %c3_539 = arith.constant 3 : index
    %c0_540 = arith.constant 0 : index
    %c14_541 = arith.constant 14 : index
    %c0_542 = arith.constant 0 : index
    %122 = vector.load %arg1[%c0_538, %c3_539, %c0_540, %c14_541, %c0_542] : memref<1x5x8x16x8xf32, #tpu.memory_space<vmem>>, vector<1x1x1x1x8xf32>
    %c0_543 = arith.constant 0 : index
    %c3_544 = arith.constant 3 : index
    %c0_545 = arith.constant 0 : index
    %c13_546 = arith.constant 13 : index
    %c0_547 = arith.constant 0 : index
    %123 = vector.load %arg1[%c0_543, %c3_544, %c0_545, %c13_546, %c0_547] : memref<1x5x8x16x8xf32, #tpu.memory_space<vmem>>, vector<1x1x1x1x8xf32>
    %c0_548 = arith.constant 0 : index
    %c3_549 = arith.constant 3 : index
    %c0_550 = arith.constant 0 : index
    %c12_551 = arith.constant 12 : index
    %c0_552 = arith.constant 0 : index
    %124 = vector.load %arg1[%c0_548, %c3_549, %c0_550, %c12_551, %c0_552] : memref<1x5x8x16x8xf32, #tpu.memory_space<vmem>>, vector<1x1x1x1x8xf32>
    %c0_553 = arith.constant 0 : index
    %c3_554 = arith.constant 3 : index
    %c0_555 = arith.constant 0 : index
    %c11_556 = arith.constant 11 : index
    %c0_557 = arith.constant 0 : index
    %125 = vector.load %arg1[%c0_553, %c3_554, %c0_555, %c11_556, %c0_557] : memref<1x5x8x16x8xf32, #tpu.memory_space<vmem>>, vector<1x1x1x1x8xf32>
    %c0_558 = arith.constant 0 : index
    %c3_559 = arith.constant 3 : index
    %c0_560 = arith.constant 0 : index
    %c10_561 = arith.constant 10 : index
    %c0_562 = arith.constant 0 : index
    %126 = vector.load %arg1[%c0_558, %c3_559, %c0_560, %c10_561, %c0_562] : memref<1x5x8x16x8xf32, #tpu.memory_space<vmem>>, vector<1x1x1x1x8xf32>
    %c0_563 = arith.constant 0 : index
    %c3_564 = arith.constant 3 : index
    %c0_565 = arith.constant 0 : index
    %c9_566 = arith.constant 9 : index
    %c0_567 = arith.constant 0 : index
    %127 = vector.load %arg1[%c0_563, %c3_564, %c0_565, %c9_566, %c0_567] : memref<1x5x8x16x8xf32, #tpu.memory_space<vmem>>, vector<1x1x1x1x8xf32>
    %c0_568 = arith.constant 0 : index
    %c3_569 = arith.constant 3 : index
    %c0_570 = arith.constant 0 : index
    %c8_571 = arith.constant 8 : index
    %c0_572 = arith.constant 0 : index
    %128 = vector.load %arg1[%c0_568, %c3_569, %c0_570, %c8_571, %c0_572] : memref<1x5x8x16x8xf32, #tpu.memory_space<vmem>>, vector<1x1x1x1x8xf32>
    %129 = tpu.concatenate %121, %122, %123, %124, %125, %126, %127, %128 in 2 : vector<1x1x1x1x8xf32>, vector<1x1x1x1x8xf32>, vector<1x1x1x1x8xf32>, vector<1x1x1x1x8xf32>, vector<1x1x1x1x8xf32>, vector<1x1x1x1x8xf32>, vector<1x1x1x1x8xf32>, vector<1x1x1x1x8xf32> -> vector<1x1x8x1x8xf32>
    %c0_573 = arith.constant 0 : index
    %c2_574 = arith.constant 2 : index
    %c2_575 = arith.constant 2 : index
    %c17_576 = arith.constant 17 : index
    %c0_577 = arith.constant 0 : index
    %130 = vector.load %arg2[%c0_573, %c2_574, %c2_575, %c17_576, %c0_577] : memref<1x5x10x18x8xf32, #tpu.memory_space<vmem>>, vector<1x1x8x1x8xf32>
    tpu.vector_store %arg2[%c0_573, %c2_574, %c2_575, %c17_576, %c0_577], %129 {strides = array<i32>} : memref<1x5x10x18x8xf32, #tpu.memory_space<vmem>>, vector<1x1x8x1x8xf32>,
    %c0_578 = arith.constant 0 : index
    %c2_579 = arith.constant 2 : index
    %c7_580 = arith.constant 7 : index
    %c8_581 = arith.constant 8 : index
    %c0_582 = arith.constant 0 : index
    %131 = vector.load %arg1[%c0_578, %c2_579, %c7_580, %c8_581, %c0_582] : memref<1x5x8x16x8xf32, #tpu.memory_space<vmem>>, vector<1x1x1x8x8xf32>
    %c0_583 = arith.constant 0 : index
    %c3_584 = arith.constant 3 : index
    %c0_585 = arith.constant 0 : index
    %c1_586 = arith.constant 1 : index
    %c0_587 = arith.constant 0 : index
    %132 = vector.load %arg2[%c0_583, %c3_584, %c0_585, %c1_586, %c0_587] : memref<1x5x10x18x8xf32, #tpu.memory_space<vmem>>, vector<1x1x1x8x8xf32>
    tpu.vector_store %arg2[%c0_583, %c3_584, %c0_585, %c1_586, %c0_587], %131 {strides = array<i32>} : memref<1x5x10x18x8xf32, #tpu.memory_space<vmem>>, vector<1x1x1x8x8xf32>,
    %c0_588 = arith.constant 0 : index
    %c2_589 = arith.constant 2 : index
    %c7_590 = arith.constant 7 : index
    %c15_591 = arith.constant 15 : index
    %c0_592 = arith.constant 0 : index
    %133 = vector.load %arg1[%c0_588, %c2_589, %c7_590, %c15_591, %c0_592] : memref<1x5x8x16x8xf32, #tpu.memory_space<vmem>>, vector<1x1x1x1x8xf32>
    %c0_593 = arith.constant 0 : index
    %c2_594 = arith.constant 2 : index
    %c6_595 = arith.constant 6 : index
    %c15_596 = arith.constant 15 : index
    %c0_597 = arith.constant 0 : index
    %134 = vector.load %arg1[%c0_593, %c2_594, %c6_595, %c15_596, %c0_597] : memref<1x5x8x16x8xf32, #tpu.memory_space<vmem>>, vector<1x1x1x1x8xf32>
    %c0_598 = arith.constant 0 : index
    %c2_599 = arith.constant 2 : index
    %c5_600 = arith.constant 5 : index
    %c15_601 = arith.constant 15 : index
    %c0_602 = arith.constant 0 : index
    %135 = vector.load %arg1[%c0_598, %c2_599, %c5_600, %c15_601, %c0_602] : memref<1x5x8x16x8xf32, #tpu.memory_space<vmem>>, vector<1x1x1x1x8xf32>
    %c0_603 = arith.constant 0 : index
    %c2_604 = arith.constant 2 : index
    %c4_605 = arith.constant 4 : index
    %c15_606 = arith.constant 15 : index
    %c0_607 = arith.constant 0 : index
    %136 = vector.load %arg1[%c0_603, %c2_604, %c4_605, %c15_606, %c0_607] : memref<1x5x8x16x8xf32, #tpu.memory_space<vmem>>, vector<1x1x1x1x8xf32>
    %c0_608 = arith.constant 0 : index
    %c2_609 = arith.constant 2 : index
    %c3_610 = arith.constant 3 : index
    %c15_611 = arith.constant 15 : index
    %c0_612 = arith.constant 0 : index
    %137 = vector.load %arg1[%c0_608, %c2_609, %c3_610, %c15_611, %c0_612] : memref<1x5x8x16x8xf32, #tpu.memory_space<vmem>>, vector<1x1x1x1x8xf32>
    %c0_613 = arith.constant 0 : index
    %c2_614 = arith.constant 2 : index
    %c2_615 = arith.constant 2 : index
    %c15_616 = arith.constant 15 : index
    %c0_617 = arith.constant 0 : index
    %138 = vector.load %arg1[%c0_613, %c2_614, %c2_615, %c15_616, %c0_617] : memref<1x5x8x16x8xf32, #tpu.memory_space<vmem>>, vector<1x1x1x1x8xf32>
    %c0_618 = arith.constant 0 : index
    %c2_619 = arith.constant 2 : index
    %c1_620 = arith.constant 1 : index
    %c15_621 = arith.constant 15 : index
    %c0_622 = arith.constant 0 : index
    %139 = vector.load %arg1[%c0_618, %c2_619, %c1_620, %c15_621, %c0_622] : memref<1x5x8x16x8xf32, #tpu.memory_space<vmem>>, vector<1x1x1x1x8xf32>
    %c0_623 = arith.constant 0 : index
    %c2_624 = arith.constant 2 : index
    %c0_625 = arith.constant 0 : index
    %c15_626 = arith.constant 15 : index
    %c0_627 = arith.constant 0 : index
    %140 = vector.load %arg1[%c0_623, %c2_624, %c0_625, %c15_626, %c0_627] : memref<1x5x8x16x8xf32, #tpu.memory_space<vmem>>, vector<1x1x1x1x8xf32>
    %141 = tpu.concatenate %133, %134, %135, %136, %137, %138, %139, %140 in 3 : vector<1x1x1x1x8xf32>, vector<1x1x1x1x8xf32>, vector<1x1x1x1x8xf32>, vector<1x1x1x1x8xf32>, vector<1x1x1x1x8xf32>, vector<1x1x1x1x8xf32>, vector<1x1x1x1x8xf32>, vector<1x1x1x1x8xf32> -> vector<1x1x1x8x8xf32>
    %c0_628 = arith.constant 0 : index
    %c3_629 = arith.constant 3 : index
    %c0_630 = arith.constant 0 : index
    %c9_631 = arith.constant 9 : index
    %c0_632 = arith.constant 0 : index
    %142 = vector.load %arg2[%c0_628, %c3_629, %c0_630, %c9_631, %c0_632] : memref<1x5x10x18x8xf32, #tpu.memory_space<vmem>>, vector<1x1x1x8x8xf32>
    tpu.vector_store %arg2[%c0_628, %c3_629, %c0_630, %c9_631, %c0_632], %141 {strides = array<i32>} : memref<1x5x10x18x8xf32, #tpu.memory_space<vmem>>, vector<1x1x1x8x8xf32>,
    %c0_633 = arith.constant 0 : index
    %c4_634 = arith.constant 4 : index
    %c7_635 = arith.constant 7 : index
    %c0_636 = arith.constant 0 : index
    %c0_637 = arith.constant 0 : index
    %143 = vector.load %arg1[%c0_633, %c4_634, %c7_635, %c0_636, %c0_637] : memref<1x5x8x16x8xf32, #tpu.memory_space<vmem>>, vector<1x1x1x1x8xf32>
    %c0_638 = arith.constant 0 : index
    %c4_639 = arith.constant 4 : index
    %c6_640 = arith.constant 6 : index
    %c0_641 = arith.constant 0 : index
    %c0_642 = arith.constant 0 : index
    %144 = vector.load %arg1[%c0_638, %c4_639, %c6_640, %c0_641, %c0_642] : memref<1x5x8x16x8xf32, #tpu.memory_space<vmem>>, vector<1x1x1x1x8xf32>
    %c0_643 = arith.constant 0 : index
    %c4_644 = arith.constant 4 : index
    %c5_645 = arith.constant 5 : index
    %c0_646 = arith.constant 0 : index
    %c0_647 = arith.constant 0 : index
    %145 = vector.load %arg1[%c0_643, %c4_644, %c5_645, %c0_646, %c0_647] : memref<1x5x8x16x8xf32, #tpu.memory_space<vmem>>, vector<1x1x1x1x8xf32>
    %c0_648 = arith.constant 0 : index
    %c4_649 = arith.constant 4 : index
    %c4_650 = arith.constant 4 : index
    %c0_651 = arith.constant 0 : index
    %c0_652 = arith.constant 0 : index
    %146 = vector.load %arg1[%c0_648, %c4_649, %c4_650, %c0_651, %c0_652] : memref<1x5x8x16x8xf32, #tpu.memory_space<vmem>>, vector<1x1x1x1x8xf32>
    %c0_653 = arith.constant 0 : index
    %c4_654 = arith.constant 4 : index
    %c3_655 = arith.constant 3 : index
    %c0_656 = arith.constant 0 : index
    %c0_657 = arith.constant 0 : index
    %147 = vector.load %arg1[%c0_653, %c4_654, %c3_655, %c0_656, %c0_657] : memref<1x5x8x16x8xf32, #tpu.memory_space<vmem>>, vector<1x1x1x1x8xf32>
    %c0_658 = arith.constant 0 : index
    %c4_659 = arith.constant 4 : index
    %c2_660 = arith.constant 2 : index
    %c0_661 = arith.constant 0 : index
    %c0_662 = arith.constant 0 : index
    %148 = vector.load %arg1[%c0_658, %c4_659, %c2_660, %c0_661, %c0_662] : memref<1x5x8x16x8xf32, #tpu.memory_space<vmem>>, vector<1x1x1x1x8xf32>
    %c0_663 = arith.constant 0 : index
    %c4_664 = arith.constant 4 : index
    %c1_665 = arith.constant 1 : index
    %c0_666 = arith.constant 0 : index
    %c0_667 = arith.constant 0 : index
    %149 = vector.load %arg1[%c0_663, %c4_664, %c1_665, %c0_666, %c0_667] : memref<1x5x8x16x8xf32, #tpu.memory_space<vmem>>, vector<1x1x1x1x8xf32>
    %150 = tpu.concatenate %143, %144, %145, %146, %147, %148, %149 in 3 : vector<1x1x1x1x8xf32>, vector<1x1x1x1x8xf32>, vector<1x1x1x1x8xf32>, vector<1x1x1x1x8xf32>, vector<1x1x1x1x8xf32>, vector<1x1x1x1x8xf32>, vector<1x1x1x1x8xf32> -> vector<1x1x1x7x8xf32>
    %c0_668 = arith.constant 0 : index
    %c3_669 = arith.constant 3 : index
    %c9_670 = arith.constant 9 : index
    %c2_671 = arith.constant 2 : index
    %c0_672 = arith.constant 0 : index
    %151 = vector.load %arg2[%c0_668, %c3_669, %c9_670, %c2_671, %c0_672] : memref<1x5x10x18x8xf32, #tpu.memory_space<vmem>>, vector<1x1x1x7x8xf32>
    tpu.vector_store %arg2[%c0_668, %c3_669, %c9_670, %c2_671, %c0_672], %150 {strides = array<i32>} : memref<1x5x10x18x8xf32, #tpu.memory_space<vmem>>, vector<1x1x1x7x8xf32>,
    %c0_673 = arith.constant 0 : index
    %c4_674 = arith.constant 4 : index
    %c0_675 = arith.constant 0 : index
    %c0_676 = arith.constant 0 : index
    %c0_677 = arith.constant 0 : index
    %152 = vector.load %arg1[%c0_673, %c4_674, %c0_675, %c0_676, %c0_677] : memref<1x5x8x16x8xf32, #tpu.memory_space<vmem>>, vector<1x1x1x8x8xf32>
    %c0_678 = arith.constant 0 : index
    %c3_679 = arith.constant 3 : index
    %c9_680 = arith.constant 9 : index
    %c9_681 = arith.constant 9 : index
    %c0_682 = arith.constant 0 : index
    %153 = vector.load %arg2[%c0_678, %c3_679, %c9_680, %c9_681, %c0_682] : memref<1x5x10x18x8xf32, #tpu.memory_space<vmem>>, vector<1x1x1x8x8xf32>
    tpu.vector_store %arg2[%c0_678, %c3_679, %c9_680, %c9_681, %c0_682], %152 {strides = array<i32>} : memref<1x5x10x18x8xf32, #tpu.memory_space<vmem>>, vector<1x1x1x8x8xf32>,
    %c0_683 = arith.constant 0 : index
    %c2_684 = arith.constant 2 : index
    %c7_685 = arith.constant 7 : index
    %c7_686 = arith.constant 7 : index
    %c0_687 = arith.constant 0 : index
    %154 = vector.load %arg1[%c0_683, %c2_684, %c7_685, %c7_686, %c0_687] : memref<1x5x8x16x8xf32, #tpu.memory_space<vmem>>, vector<1x1x1x1x8xf32>
    %c0_688 = arith.constant 0 : index
    %c2_689 = arith.constant 2 : index
    %c7_690 = arith.constant 7 : index
    %c6_691 = arith.constant 6 : index
    %c0_692 = arith.constant 0 : index
    %155 = vector.load %arg1[%c0_688, %c2_689, %c7_690, %c6_691, %c0_692] : memref<1x5x8x16x8xf32, #tpu.memory_space<vmem>>, vector<1x1x1x1x8xf32>
    %c0_693 = arith.constant 0 : index
    %c2_694 = arith.constant 2 : index
    %c7_695 = arith.constant 7 : index
    %c5_696 = arith.constant 5 : index
    %c0_697 = arith.constant 0 : index
    %156 = vector.load %arg1[%c0_693, %c2_694, %c7_695, %c5_696, %c0_697] : memref<1x5x8x16x8xf32, #tpu.memory_space<vmem>>, vector<1x1x1x1x8xf32>
    %c0_698 = arith.constant 0 : index
    %c2_699 = arith.constant 2 : index
    %c7_700 = arith.constant 7 : index
    %c4_701 = arith.constant 4 : index
    %c0_702 = arith.constant 0 : index
    %157 = vector.load %arg1[%c0_698, %c2_699, %c7_700, %c4_701, %c0_702] : memref<1x5x8x16x8xf32, #tpu.memory_space<vmem>>, vector<1x1x1x1x8xf32>
    %c0_703 = arith.constant 0 : index
    %c2_704 = arith.constant 2 : index
    %c7_705 = arith.constant 7 : index
    %c3_706 = arith.constant 3 : index
    %c0_707 = arith.constant 0 : index
    %158 = vector.load %arg1[%c0_703, %c2_704, %c7_705, %c3_706, %c0_707] : memref<1x5x8x16x8xf32, #tpu.memory_space<vmem>>, vector<1x1x1x1x8xf32>
    %c0_708 = arith.constant 0 : index
    %c2_709 = arith.constant 2 : index
    %c7_710 = arith.constant 7 : index
    %c2_711 = arith.constant 2 : index
    %c0_712 = arith.constant 0 : index
    %159 = vector.load %arg1[%c0_708, %c2_709, %c7_710, %c2_711, %c0_712] : memref<1x5x8x16x8xf32, #tpu.memory_space<vmem>>, vector<1x1x1x1x8xf32>
    %c0_713 = arith.constant 0 : index
    %c2_714 = arith.constant 2 : index
    %c7_715 = arith.constant 7 : index
    %c1_716 = arith.constant 1 : index
    %c0_717 = arith.constant 0 : index
    %160 = vector.load %arg1[%c0_713, %c2_714, %c7_715, %c1_716, %c0_717] : memref<1x5x8x16x8xf32, #tpu.memory_space<vmem>>, vector<1x1x1x1x8xf32>
    %c0_718 = arith.constant 0 : index
    %c2_719 = arith.constant 2 : index
    %c7_720 = arith.constant 7 : index
    %c0_721 = arith.constant 0 : index
    %c0_722 = arith.constant 0 : index
    %161 = vector.load %arg1[%c0_718, %c2_719, %c7_720, %c0_721, %c0_722] : memref<1x5x8x16x8xf32, #tpu.memory_space<vmem>>, vector<1x1x1x1x8xf32>
    %162 = tpu.concatenate %154, %155, %156, %157, %158, %159, %160, %161 in 2 : vector<1x1x1x1x8xf32>, vector<1x1x1x1x8xf32>, vector<1x1x1x1x8xf32>, vector<1x1x1x1x8xf32>, vector<1x1x1x1x8xf32>, vector<1x1x1x1x8xf32>, vector<1x1x1x1x8xf32>, vector<1x1x1x1x8xf32> -> vector<1x1x8x1x8xf32>
    %c0_723 = arith.constant 0 : index
    %c3_724 = arith.constant 3 : index
    %c1_725 = arith.constant 1 : index
    %c0_726 = arith.constant 0 : index
    %c0_727 = arith.constant 0 : index
    %163 = vector.load %arg2[%c0_723, %c3_724, %c1_725, %c0_726, %c0_727] : memref<1x5x10x18x8xf32, #tpu.memory_space<vmem>>, vector<1x1x8x1x8xf32>
    tpu.vector_store %arg2[%c0_723, %c3_724, %c1_725, %c0_726, %c0_727], %162 {strides = array<i32>} : memref<1x5x10x18x8xf32, #tpu.memory_space<vmem>>, vector<1x1x8x1x8xf32>,
    %c0_728 = arith.constant 0 : index
    %c4_729 = arith.constant 4 : index
    %c0_730 = arith.constant 0 : index
    %c15_731 = arith.constant 15 : index
    %c0_732 = arith.constant 0 : index
    %164 = vector.load %arg1[%c0_728, %c4_729, %c0_730, %c15_731, %c0_732] : memref<1x5x8x16x8xf32, #tpu.memory_space<vmem>>, vector<1x1x1x1x8xf32>
    %c0_733 = arith.constant 0 : index
    %c4_734 = arith.constant 4 : index
    %c0_735 = arith.constant 0 : index
    %c14_736 = arith.constant 14 : index
    %c0_737 = arith.constant 0 : index
    %165 = vector.load %arg1[%c0_733, %c4_734, %c0_735, %c14_736, %c0_737] : memref<1x5x8x16x8xf32, #tpu.memory_space<vmem>>, vector<1x1x1x1x8xf32>
    %c0_738 = arith.constant 0 : index
    %c4_739 = arith.constant 4 : index
    %c0_740 = arith.constant 0 : index
    %c13_741 = arith.constant 13 : index
    %c0_742 = arith.constant 0 : index
    %166 = vector.load %arg1[%c0_738, %c4_739, %c0_740, %c13_741, %c0_742] : memref<1x5x8x16x8xf32, #tpu.memory_space<vmem>>, vector<1x1x1x1x8xf32>
    %c0_743 = arith.constant 0 : index
    %c4_744 = arith.constant 4 : index
    %c0_745 = arith.constant 0 : index
    %c12_746 = arith.constant 12 : index
    %c0_747 = arith.constant 0 : index
    %167 = vector.load %arg1[%c0_743, %c4_744, %c0_745, %c12_746, %c0_747] : memref<1x5x8x16x8xf32, #tpu.memory_space<vmem>>, vector<1x1x1x1x8xf32>
    %c0_748 = arith.constant 0 : index
    %c4_749 = arith.constant 4 : index
    %c0_750 = arith.constant 0 : index
    %c11_751 = arith.constant 11 : index
    %c0_752 = arith.constant 0 : index
    %168 = vector.load %arg1[%c0_748, %c4_749, %c0_750, %c11_751, %c0_752] : memref<1x5x8x16x8xf32, #tpu.memory_space<vmem>>, vector<1x1x1x1x8xf32>
    %c0_753 = arith.constant 0 : index
    %c4_754 = arith.constant 4 : index
    %c0_755 = arith.constant 0 : index
    %c10_756 = arith.constant 10 : index
    %c0_757 = arith.constant 0 : index
    %169 = vector.load %arg1[%c0_753, %c4_754, %c0_755, %c10_756, %c0_757] : memref<1x5x8x16x8xf32, #tpu.memory_space<vmem>>, vector<1x1x1x1x8xf32>
    %c0_758 = arith.constant 0 : index
    %c4_759 = arith.constant 4 : index
    %c0_760 = arith.constant 0 : index
    %c9_761 = arith.constant 9 : index
    %c0_762 = arith.constant 0 : index
    %170 = vector.load %arg1[%c0_758, %c4_759, %c0_760, %c9_761, %c0_762] : memref<1x5x8x16x8xf32, #tpu.memory_space<vmem>>, vector<1x1x1x1x8xf32>
    %c0_763 = arith.constant 0 : index
    %c4_764 = arith.constant 4 : index
    %c0_765 = arith.constant 0 : index
    %c8_766 = arith.constant 8 : index
    %c0_767 = arith.constant 0 : index
    %171 = vector.load %arg1[%c0_763, %c4_764, %c0_765, %c8_766, %c0_767] : memref<1x5x8x16x8xf32, #tpu.memory_space<vmem>>, vector<1x1x1x1x8xf32>
    %172 = tpu.concatenate %164, %165, %166, %167, %168, %169, %170, %171 in 2 : vector<1x1x1x1x8xf32>, vector<1x1x1x1x8xf32>, vector<1x1x1x1x8xf32>, vector<1x1x1x1x8xf32>, vector<1x1x1x1x8xf32>, vector<1x1x1x1x8xf32>, vector<1x1x1x1x8xf32>, vector<1x1x1x1x8xf32> -> vector<1x1x8x1x8xf32>
    %c0_768 = arith.constant 0 : index
    %c3_769 = arith.constant 3 : index
    %c2_770 = arith.constant 2 : index
    %c17_771 = arith.constant 17 : index
    %c0_772 = arith.constant 0 : index
    %173 = vector.load %arg2[%c0_768, %c3_769, %c2_770, %c17_771, %c0_772] : memref<1x5x10x18x8xf32, #tpu.memory_space<vmem>>, vector<1x1x8x1x8xf32>
    tpu.vector_store %arg2[%c0_768, %c3_769, %c2_770, %c17_771, %c0_772], %172 {strides = array<i32>} : memref<1x5x10x18x8xf32, #tpu.memory_space<vmem>>, vector<1x1x8x1x8xf32>,
    %c0_773 = arith.constant 0 : index
    %c3_774 = arith.constant 3 : index
    %c7_775 = arith.constant 7 : index
    %c8_776 = arith.constant 8 : index
    %c0_777 = arith.constant 0 : index
    %174 = vector.load %arg1[%c0_773, %c3_774, %c7_775, %c8_776, %c0_777] : memref<1x5x8x16x8xf32, #tpu.memory_space<vmem>>, vector<1x1x1x8x8xf32>
    %c0_778 = arith.constant 0 : index
    %c4_779 = arith.constant 4 : index
    %c0_780 = arith.constant 0 : index
    %c1_781 = arith.constant 1 : index
    %c0_782 = arith.constant 0 : index
    %175 = vector.load %arg2[%c0_778, %c4_779, %c0_780, %c1_781, %c0_782] : memref<1x5x10x18x8xf32, #tpu.memory_space<vmem>>, vector<1x1x1x8x8xf32>
    tpu.vector_store %arg2[%c0_778, %c4_779, %c0_780, %c1_781, %c0_782], %174 {strides = array<i32>} : memref<1x5x10x18x8xf32, #tpu.memory_space<vmem>>, vector<1x1x1x8x8xf32>,
    %c0_783 = arith.constant 0 : index
    %c3_784 = arith.constant 3 : index
    %c7_785 = arith.constant 7 : index
    %c15_786 = arith.constant 15 : index
    %c0_787 = arith.constant 0 : index
    %176 = vector.load %arg1[%c0_783, %c3_784, %c7_785, %c15_786, %c0_787] : memref<1x5x8x16x8xf32, #tpu.memory_space<vmem>>, vector<1x1x1x1x8xf32>
    %c0_788 = arith.constant 0 : index
    %c3_789 = arith.constant 3 : index
    %c6_790 = arith.constant 6 : index
    %c15_791 = arith.constant 15 : index
    %c0_792 = arith.constant 0 : index
    %177 = vector.load %arg1[%c0_788, %c3_789, %c6_790, %c15_791, %c0_792] : memref<1x5x8x16x8xf32, #tpu.memory_space<vmem>>, vector<1x1x1x1x8xf32>
    %c0_793 = arith.constant 0 : index
    %c3_794 = arith.constant 3 : index
    %c5_795 = arith.constant 5 : index
    %c15_796 = arith.constant 15 : index
    %c0_797 = arith.constant 0 : index
    %178 = vector.load %arg1[%c0_793, %c3_794, %c5_795, %c15_796, %c0_797] : memref<1x5x8x16x8xf32, #tpu.memory_space<vmem>>, vector<1x1x1x1x8xf32>
    %c0_798 = arith.constant 0 : index
    %c3_799 = arith.constant 3 : index
    %c4_800 = arith.constant 4 : index
    %c15_801 = arith.constant 15 : index
    %c0_802 = arith.constant 0 : index
    %179 = vector.load %arg1[%c0_798, %c3_799, %c4_800, %c15_801, %c0_802] : memref<1x5x8x16x8xf32, #tpu.memory_space<vmem>>, vector<1x1x1x1x8xf32>
    %c0_803 = arith.constant 0 : index
    %c3_804 = arith.constant 3 : index
    %c3_805 = arith.constant 3 : index
    %c15_806 = arith.constant 15 : index
    %c0_807 = arith.constant 0 : index
    %180 = vector.load %arg1[%c0_803, %c3_804, %c3_805, %c15_806, %c0_807] : memref<1x5x8x16x8xf32, #tpu.memory_space<vmem>>, vector<1x1x1x1x8xf32>
    %c0_808 = arith.constant 0 : index
    %c3_809 = arith.constant 3 : index
    %c2_810 = arith.constant 2 : index
    %c15_811 = arith.constant 15 : index
    %c0_812 = arith.constant 0 : index
    %181 = vector.load %arg1[%c0_808, %c3_809, %c2_810, %c15_811, %c0_812] : memref<1x5x8x16x8xf32, #tpu.memory_space<vmem>>, vector<1x1x1x1x8xf32>
    %c0_813 = arith.constant 0 : index
    %c3_814 = arith.constant 3 : index
    %c1_815 = arith.constant 1 : index
    %c15_816 = arith.constant 15 : index
    %c0_817 = arith.constant 0 : index
    %182 = vector.load %arg1[%c0_813, %c3_814, %c1_815, %c15_816, %c0_817] : memref<1x5x8x16x8xf32, #tpu.memory_space<vmem>>, vector<1x1x1x1x8xf32>
    %c0_818 = arith.constant 0 : index
    %c3_819 = arith.constant 3 : index
    %c0_820 = arith.constant 0 : index
    %c15_821 = arith.constant 15 : index
    %c0_822 = arith.constant 0 : index
    %183 = vector.load %arg1[%c0_818, %c3_819, %c0_820, %c15_821, %c0_822] : memref<1x5x8x16x8xf32, #tpu.memory_space<vmem>>, vector<1x1x1x1x8xf32>
    %184 = tpu.concatenate %176, %177, %178, %179, %180, %181, %182, %183 in 3 : vector<1x1x1x1x8xf32>, vector<1x1x1x1x8xf32>, vector<1x1x1x1x8xf32>, vector<1x1x1x1x8xf32>, vector<1x1x1x1x8xf32>, vector<1x1x1x1x8xf32>, vector<1x1x1x1x8xf32>, vector<1x1x1x1x8xf32> -> vector<1x1x1x8x8xf32>
    %c0_823 = arith.constant 0 : index
    %c4_824 = arith.constant 4 : index
    %c0_825 = arith.constant 0 : index
    %c9_826 = arith.constant 9 : index
    %c0_827 = arith.constant 0 : index
    %185 = vector.load %arg2[%c0_823, %c4_824, %c0_825, %c9_826, %c0_827] : memref<1x5x10x18x8xf32, #tpu.memory_space<vmem>>, vector<1x1x1x8x8xf32>
    tpu.vector_store %arg2[%c0_823, %c4_824, %c0_825, %c9_826, %c0_827], %184 {strides = array<i32>} : memref<1x5x10x18x8xf32, #tpu.memory_space<vmem>>, vector<1x1x1x8x8xf32>,
    %c0_828 = arith.constant 0 : index
    %c0_829 = arith.constant 0 : index
    %c7_830 = arith.constant 7 : index
    %c0_831 = arith.constant 0 : index
    %c0_832 = arith.constant 0 : index
    %186 = vector.load %arg1[%c0_828, %c0_829, %c7_830, %c0_831, %c0_832] : memref<1x5x8x16x8xf32, #tpu.memory_space<vmem>>, vector<1x1x1x1x8xf32>
    %c0_833 = arith.constant 0 : index
    %c0_834 = arith.constant 0 : index
    %c6_835 = arith.constant 6 : index
    %c0_836 = arith.constant 0 : index
    %c0_837 = arith.constant 0 : index
    %187 = vector.load %arg1[%c0_833, %c0_834, %c6_835, %c0_836, %c0_837] : memref<1x5x8x16x8xf32, #tpu.memory_space<vmem>>, vector<1x1x1x1x8xf32>
    %c0_838 = arith.constant 0 : index
    %c0_839 = arith.constant 0 : index
    %c5_840 = arith.constant 5 : index
    %c0_841 = arith.constant 0 : index
    %c0_842 = arith.constant 0 : index
    %188 = vector.load %arg1[%c0_838, %c0_839, %c5_840, %c0_841, %c0_842] : memref<1x5x8x16x8xf32, #tpu.memory_space<vmem>>, vector<1x1x1x1x8xf32>
    %c0_843 = arith.constant 0 : index
    %c0_844 = arith.constant 0 : index
    %c4_845 = arith.constant 4 : index
    %c0_846 = arith.constant 0 : index
    %c0_847 = arith.constant 0 : index
    %189 = vector.load %arg1[%c0_843, %c0_844, %c4_845, %c0_846, %c0_847] : memref<1x5x8x16x8xf32, #tpu.memory_space<vmem>>, vector<1x1x1x1x8xf32>
    %c0_848 = arith.constant 0 : index
    %c0_849 = arith.constant 0 : index
    %c3_850 = arith.constant 3 : index
    %c0_851 = arith.constant 0 : index
    %c0_852 = arith.constant 0 : index
    %190 = vector.load %arg1[%c0_848, %c0_849, %c3_850, %c0_851, %c0_852] : memref<1x5x8x16x8xf32, #tpu.memory_space<vmem>>, vector<1x1x1x1x8xf32>
    %c0_853 = arith.constant 0 : index
    %c0_854 = arith.constant 0 : index
    %c2_855 = arith.constant 2 : index
    %c0_856 = arith.constant 0 : index
    %c0_857 = arith.constant 0 : index
    %191 = vector.load %arg1[%c0_853, %c0_854, %c2_855, %c0_856, %c0_857] : memref<1x5x8x16x8xf32, #tpu.memory_space<vmem>>, vector<1x1x1x1x8xf32>
    %c0_858 = arith.constant 0 : index
    %c0_859 = arith.constant 0 : index
    %c1_860 = arith.constant 1 : index
    %c0_861 = arith.constant 0 : index
    %c0_862 = arith.constant 0 : index
    %192 = vector.load %arg1[%c0_858, %c0_859, %c1_860, %c0_861, %c0_862] : memref<1x5x8x16x8xf32, #tpu.memory_space<vmem>>, vector<1x1x1x1x8xf32>
    %193 = tpu.concatenate %186, %187, %188, %189, %190, %191, %192 in 3 : vector<1x1x1x1x8xf32>, vector<1x1x1x1x8xf32>, vector<1x1x1x1x8xf32>, vector<1x1x1x1x8xf32>, vector<1x1x1x1x8xf32>, vector<1x1x1x1x8xf32>, vector<1x1x1x1x8xf32> -> vector<1x1x1x7x8xf32>
    %c0_863 = arith.constant 0 : index
    %c4_864 = arith.constant 4 : index
    %c9_865 = arith.constant 9 : index
    %c2_866 = arith.constant 2 : index
    %c0_867 = arith.constant 0 : index
    %194 = vector.load %arg2[%c0_863, %c4_864, %c9_865, %c2_866, %c0_867] : memref<1x5x10x18x8xf32, #tpu.memory_space<vmem>>, vector<1x1x1x7x8xf32>
    tpu.vector_store %arg2[%c0_863, %c4_864, %c9_865, %c2_866, %c0_867], %193 {strides = array<i32>} : memref<1x5x10x18x8xf32, #tpu.memory_space<vmem>>, vector<1x1x1x7x8xf32>,
    %c0_868 = arith.constant 0 : index
    %c0_869 = arith.constant 0 : index
    %c0_870 = arith.constant 0 : index
    %c0_871 = arith.constant 0 : index
    %c0_872 = arith.constant 0 : index
    %195 = vector.load %arg1[%c0_868, %c0_869, %c0_870, %c0_871, %c0_872] : memref<1x5x8x16x8xf32, #tpu.memory_space<vmem>>, vector<1x1x1x8x8xf32>
    %c0_873 = arith.constant 0 : index
    %c4_874 = arith.constant 4 : index
    %c9_875 = arith.constant 9 : index
    %c9_876 = arith.constant 9 : index
    %c0_877 = arith.constant 0 : index
    %196 = vector.load %arg2[%c0_873, %c4_874, %c9_875, %c9_876, %c0_877] : memref<1x5x10x18x8xf32, #tpu.memory_space<vmem>>, vector<1x1x1x8x8xf32>
    tpu.vector_store %arg2[%c0_873, %c4_874, %c9_875, %c9_876, %c0_877], %195 {strides = array<i32>} : memref<1x5x10x18x8xf32, #tpu.memory_space<vmem>>, vector<1x1x1x8x8xf32>,
    %c0_878 = arith.constant 0 : index
    %c3_879 = arith.constant 3 : index
    %c7_880 = arith.constant 7 : index
    %c7_881 = arith.constant 7 : index
    %c0_882 = arith.constant 0 : index
    %197 = vector.load %arg1[%c0_878, %c3_879, %c7_880, %c7_881, %c0_882] : memref<1x5x8x16x8xf32, #tpu.memory_space<vmem>>, vector<1x1x1x1x8xf32>
    %c0_883 = arith.constant 0 : index
    %c3_884 = arith.constant 3 : index
    %c7_885 = arith.constant 7 : index
    %c6_886 = arith.constant 6 : index
    %c0_887 = arith.constant 0 : index
    %198 = vector.load %arg1[%c0_883, %c3_884, %c7_885, %c6_886, %c0_887] : memref<1x5x8x16x8xf32, #tpu.memory_space<vmem>>, vector<1x1x1x1x8xf32>
    %c0_888 = arith.constant 0 : index
    %c3_889 = arith.constant 3 : index
    %c7_890 = arith.constant 7 : index
    %c5_891 = arith.constant 5 : index
    %c0_892 = arith.constant 0 : index
    %199 = vector.load %arg1[%c0_888, %c3_889, %c7_890, %c5_891, %c0_892] : memref<1x5x8x16x8xf32, #tpu.memory_space<vmem>>, vector<1x1x1x1x8xf32>
    %c0_893 = arith.constant 0 : index
    %c3_894 = arith.constant 3 : index
    %c7_895 = arith.constant 7 : index
    %c4_896 = arith.constant 4 : index
    %c0_897 = arith.constant 0 : index
    %200 = vector.load %arg1[%c0_893, %c3_894, %c7_895, %c4_896, %c0_897] : memref<1x5x8x16x8xf32, #tpu.memory_space<vmem>>, vector<1x1x1x1x8xf32>
    %c0_898 = arith.constant 0 : index
    %c3_899 = arith.constant 3 : index
    %c7_900 = arith.constant 7 : index
    %c3_901 = arith.constant 3 : index
    %c0_902 = arith.constant 0 : index
    %201 = vector.load %arg1[%c0_898, %c3_899, %c7_900, %c3_901, %c0_902] : memref<1x5x8x16x8xf32, #tpu.memory_space<vmem>>, vector<1x1x1x1x8xf32>
    %c0_903 = arith.constant 0 : index
    %c3_904 = arith.constant 3 : index
    %c7_905 = arith.constant 7 : index
    %c2_906 = arith.constant 2 : index
    %c0_907 = arith.constant 0 : index
    %202 = vector.load %arg1[%c0_903, %c3_904, %c7_905, %c2_906, %c0_907] : memref<1x5x8x16x8xf32, #tpu.memory_space<vmem>>, vector<1x1x1x1x8xf32>
    %c0_908 = arith.constant 0 : index
    %c3_909 = arith.constant 3 : index
    %c7_910 = arith.constant 7 : index
    %c1_911 = arith.constant 1 : index
    %c0_912 = arith.constant 0 : index
    %203 = vector.load %arg1[%c0_908, %c3_909, %c7_910, %c1_911, %c0_912] : memref<1x5x8x16x8xf32, #tpu.memory_space<vmem>>, vector<1x1x1x1x8xf32>
    %c0_913 = arith.constant 0 : index
    %c3_914 = arith.constant 3 : index
    %c7_915 = arith.constant 7 : index
    %c0_916 = arith.constant 0 : index
    %c0_917 = arith.constant 0 : index
    %204 = vector.load %arg1[%c0_913, %c3_914, %c7_915, %c0_916, %c0_917] : memref<1x5x8x16x8xf32, #tpu.memory_space<vmem>>, vector<1x1x1x1x8xf32>
    %205 = tpu.concatenate %197, %198, %199, %200, %201, %202, %203, %204 in 2 : vector<1x1x1x1x8xf32>, vector<1x1x1x1x8xf32>, vector<1x1x1x1x8xf32>, vector<1x1x1x1x8xf32>, vector<1x1x1x1x8xf32>, vector<1x1x1x1x8xf32>, vector<1x1x1x1x8xf32>, vector<1x1x1x1x8xf32> -> vector<1x1x8x1x8xf32>
    %c0_918 = arith.constant 0 : index
    %c4_919 = arith.constant 4 : index
    %c1_920 = arith.constant 1 : index
    %c0_921 = arith.constant 0 : index
    %c0_922 = arith.constant 0 : index
    %206 = vector.load %arg2[%c0_918, %c4_919, %c1_920, %c0_921, %c0_922] : memref<1x5x10x18x8xf32, #tpu.memory_space<vmem>>, vector<1x1x8x1x8xf32>
    tpu.vector_store %arg2[%c0_918, %c4_919, %c1_920, %c0_921, %c0_922], %205 {strides = array<i32>} : memref<1x5x10x18x8xf32, #tpu.memory_space<vmem>>, vector<1x1x8x1x8xf32>,
    %c0_923 = arith.constant 0 : index
    %c0_924 = arith.constant 0 : index
    %c0_925 = arith.constant 0 : index
    %c15_926 = arith.constant 15 : index
    %c0_927 = arith.constant 0 : index
    %207 = vector.load %arg1[%c0_923, %c0_924, %c0_925, %c15_926, %c0_927] : memref<1x5x8x16x8xf32, #tpu.memory_space<vmem>>, vector<1x1x1x1x8xf32>
    %c0_928 = arith.constant 0 : index
    %c0_929 = arith.constant 0 : index
    %c0_930 = arith.constant 0 : index
    %c14_931 = arith.constant 14 : index
    %c0_932 = arith.constant 0 : index
    %208 = vector.load %arg1[%c0_928, %c0_929, %c0_930, %c14_931, %c0_932] : memref<1x5x8x16x8xf32, #tpu.memory_space<vmem>>, vector<1x1x1x1x8xf32>
    %c0_933 = arith.constant 0 : index
    %c0_934 = arith.constant 0 : index
    %c0_935 = arith.constant 0 : index
    %c13_936 = arith.constant 13 : index
    %c0_937 = arith.constant 0 : index
    %209 = vector.load %arg1[%c0_933, %c0_934, %c0_935, %c13_936, %c0_937] : memref<1x5x8x16x8xf32, #tpu.memory_space<vmem>>, vector<1x1x1x1x8xf32>
    %c0_938 = arith.constant 0 : index
    %c0_939 = arith.constant 0 : index
    %c0_940 = arith.constant 0 : index
    %c12_941 = arith.constant 12 : index
    %c0_942 = arith.constant 0 : index
    %210 = vector.load %arg1[%c0_938, %c0_939, %c0_940, %c12_941, %c0_942] : memref<1x5x8x16x8xf32, #tpu.memory_space<vmem>>, vector<1x1x1x1x8xf32>
    %c0_943 = arith.constant 0 : index
    %c0_944 = arith.constant 0 : index
    %c0_945 = arith.constant 0 : index
    %c11_946 = arith.constant 11 : index
    %c0_947 = arith.constant 0 : index
    %211 = vector.load %arg1[%c0_943, %c0_944, %c0_945, %c11_946, %c0_947] : memref<1x5x8x16x8xf32, #tpu.memory_space<vmem>>, vector<1x1x1x1x8xf32>
    %c0_948 = arith.constant 0 : index
    %c0_949 = arith.constant 0 : index
    %c0_950 = arith.constant 0 : index
    %c10_951 = arith.constant 10 : index
    %c0_952 = arith.constant 0 : index
    %212 = vector.load %arg1[%c0_948, %c0_949, %c0_950, %c10_951, %c0_952] : memref<1x5x8x16x8xf32, #tpu.memory_space<vmem>>, vector<1x1x1x1x8xf32>
    %c0_953 = arith.constant 0 : index
    %c0_954 = arith.constant 0 : index
    %c0_955 = arith.constant 0 : index
    %c9_956 = arith.constant 9 : index
    %c0_957 = arith.constant 0 : index
    %213 = vector.load %arg1[%c0_953, %c0_954, %c0_955, %c9_956, %c0_957] : memref<1x5x8x16x8xf32, #tpu.memory_space<vmem>>, vector<1x1x1x1x8xf32>
    %c0_958 = arith.constant 0 : index
    %c0_959 = arith.constant 0 : index
    %c0_960 = arith.constant 0 : index
    %c8_961 = arith.constant 8 : index
    %c0_962 = arith.constant 0 : index
    %214 = vector.load %arg1[%c0_958, %c0_959, %c0_960, %c8_961, %c0_962] : memref<1x5x8x16x8xf32, #tpu.memory_space<vmem>>, vector<1x1x1x1x8xf32>
    %215 = tpu.concatenate %207, %208, %209, %210, %211, %212, %213, %214 in 2 : vector<1x1x1x1x8xf32>, vector<1x1x1x1x8xf32>, vector<1x1x1x1x8xf32>, vector<1x1x1x1x8xf32>, vector<1x1x1x1x8xf32>, vector<1x1x1x1x8xf32>, vector<1x1x1x1x8xf32>, vector<1x1x1x1x8xf32> -> vector<1x1x8x1x8xf32>
    %c0_963 = arith.constant 0 : index
    %c4_964 = arith.constant 4 : index
    %c2_965 = arith.constant 2 : index
    %c17_966 = arith.constant 17 : index
    %c0_967 = arith.constant 0 : index
    %216 = vector.load %arg2[%c0_963, %c4_964, %c2_965, %c17_966, %c0_967] : memref<1x5x10x18x8xf32, #tpu.memory_space<vmem>>, vector<1x1x8x1x8xf32>
    tpu.vector_store %arg2[%c0_963, %c4_964, %c2_965, %c17_966, %c0_967], %215 {strides = array<i32>} : memref<1x5x10x18x8xf32, #tpu.memory_space<vmem>>, vector<1x1x8x1x8xf32>,
    %c0_968 = arith.constant 0 : index
    %c0_969 = arith.constant 0 : index
    %c0_970 = arith.constant 0 : index
    %c0_971 = arith.constant 0 : index
    %c0_972 = arith.constant 0 : index
    %217 = vector.load %arg1[%c0_968, %c0_969, %c0_970, %c0_971, %c0_972] : memref<1x5x8x16x8xf32, #tpu.memory_space<vmem>>, vector<1x1x1x1x8xf32>
    %218 = vector.shape_cast %217 : vector<1x1x1x1x8xf32> to vector<1x1x1x1x8xf32>
    %219 = vector.broadcast %218 : vector<1x1x1x1x8xf32> to vector<1x5x1x1x8xf32>
    %c0_973 = arith.constant 0 : index
    %c0_974 = arith.constant 0 : index
    %c0_975 = arith.constant 0 : index
    %c0_976 = arith.constant 0 : index
    %c0_977 = arith.constant 0 : index
    %220 = vector.load %arg2[%c0_973, %c0_974, %c0_975, %c0_976, %c0_977] : memref<1x5x10x18x8xf32, #tpu.memory_space<vmem>>, vector<1x5x1x1x8xf32>
    tpu.vector_store %arg2[%c0_973, %c0_974, %c0_975, %c0_976, %c0_977], %219 {strides = array<i32>} : memref<1x5x10x18x8xf32, #tpu.memory_space<vmem>>, vector<1x5x1x1x8xf32>,
    %221 = vector.shape_cast %217 : vector<1x1x1x1x8xf32> to vector<1x1x1x1x8xf32>
    %222 = vector.broadcast %221 : vector<1x1x1x1x8xf32> to vector<1x5x2x1x8xf32>
    %c0_978 = arith.constant 0 : index
    %c0_979 = arith.constant 0 : index
    %c0_980 = arith.constant 0 : index
    %c17_981 = arith.constant 17 : index
    %c0_982 = arith.constant 0 : index
    %223 = vector.load %arg2[%c0_978, %c0_979, %c0_980, %c17_981, %c0_982] : memref<1x5x10x18x8xf32, #tpu.memory_space<vmem>>, vector<1x5x2x1x8xf32>
    tpu.vector_store %arg2[%c0_978, %c0_979, %c0_980, %c17_981, %c0_982], %222 {strides = array<i32>} : memref<1x5x10x18x8xf32, #tpu.memory_space<vmem>>, vector<1x5x2x1x8xf32>,
    %224 = vector.shape_cast %217 : vector<1x1x1x1x8xf32> to vector<1x1x1x1x8xf32>
    %225 = vector.broadcast %224 : vector<1x1x1x1x8xf32> to vector<1x5x1x2x8xf32>
    %c0_983 = arith.constant 0 : index
    %c0_984 = arith.constant 0 : index
    %c9_985 = arith.constant 9 : index
    %c0_986 = arith.constant 0 : index
    %c0_987 = arith.constant 0 : index
    %226 = vector.load %arg2[%c0_983, %c0_984, %c9_985, %c0_986, %c0_987] : memref<1x5x10x18x8xf32, #tpu.memory_space<vmem>>, vector<1x5x1x2x8xf32>
    tpu.vector_store %arg2[%c0_983, %c0_984, %c9_985, %c0_986, %c0_987], %225 {strides = array<i32>} : memref<1x5x10x18x8xf32, #tpu.memory_space<vmem>>, vector<1x5x1x2x8xf32>,
    %cst = arith.constant 0.000000e+00 : f32
    %227 = vector.broadcast %cst : f32 to vector<1x5x1x1x8xf32>
    %cst_988 = arith.constant 0.000000e+00 : f32
    %228 = vector.broadcast %cst_988 : f32 to vector<1x5x2x1x8xf32>
    %cst_989 = arith.constant 0.000000e+00 : f32
    %229 = vector.broadcast %cst_989 : f32 to vector<1x5x1x2x8xf32>
    %c0_990 = arith.constant 0 : index
    %c0_991 = arith.constant 0 : index
    %c0_992 = arith.constant 0 : index
    %c16 = arith.constant 16 : index
    %c0_993 = arith.constant 0 : index
    %230 = vector.load %arg2[%c0_990, %c0_991, %c0_992, %c16, %c0_993] : memref<1x5x10x18x8xf32, #tpu.memory_space<vmem>>, vector<1x5x2x1x8xf32>
    tpu.vector_store %arg2[%c0_990, %c0_991, %c0_992, %c16, %c0_993], %228 {strides = array<i32>} : memref<1x5x10x18x8xf32, #tpu.memory_space<vmem>>, vector<1x5x2x1x8xf32>,
    %c0_994 = arith.constant 0 : index
    %c0_995 = arith.constant 0 : index
    %c2_996 = arith.constant 2 : index
    %c17_997 = arith.constant 17 : index
    %c0_998 = arith.constant 0 : index
    %231 = vector.load %arg2[%c0_994, %c0_995, %c2_996, %c17_997, %c0_998] : memref<1x5x10x18x8xf32, #tpu.memory_space<vmem>>, vector<1x5x1x1x8xf32>
    tpu.vector_store %arg2[%c0_994, %c0_995, %c2_996, %c17_997, %c0_998], %227 {strides = array<i32>} : memref<1x5x10x18x8xf32, #tpu.memory_space<vmem>>, vector<1x5x1x1x8xf32>,
    %c0_999 = arith.constant 0 : index
    %c0_1000 = arith.constant 0 : index
    %c8_1001 = arith.constant 8 : index
    %c0_1002 = arith.constant 0 : index
    %c0_1003 = arith.constant 0 : index
    %232 = vector.load %arg2[%c0_999, %c0_1000, %c8_1001, %c0_1002, %c0_1003] : memref<1x5x10x18x8xf32, #tpu.memory_space<vmem>>, vector<1x5x1x2x8xf32>
    tpu.vector_store %arg2[%c0_999, %c0_1000, %c8_1001, %c0_1002, %c0_1003], %229 {strides = array<i32>} : memref<1x5x10x18x8xf32, #tpu.memory_space<vmem>>, vector<1x5x1x2x8xf32>,
    %c0_1004 = arith.constant 0 : index
    %c0_1005 = arith.constant 0 : index
    %c9_1006 = arith.constant 9 : index
    %c2_1007 = arith.constant 2 : index
    %c0_1008 = arith.constant 0 : index
    %233 = vector.load %arg2[%c0_1004, %c0_1005, %c9_1006, %c2_1007, %c0_1008] : memref<1x5x10x18x8xf32, #tpu.memory_space<vmem>>, vector<1x5x1x1x8xf32>
    tpu.vector_store %arg2[%c0_1004, %c0_1005, %c9_1006, %c2_1007, %c0_1008], %227 {strides = array<i32>} : memref<1x5x10x18x8xf32, #tpu.memory_space<vmem>>, vector<1x5x1x1x8xf32>,
    return
  }
  func.func @transform_0(%arg0: i32) -> (i32, i32, i32, i32, i32) {
    %c0_i32 = arith.constant 0 : i32
    %c0_i32_0 = arith.constant 0 : i32
    %c0_i32_1 = arith.constant 0 : i32
    %c0_i32_2 = arith.constant 0 : i32
    %c0_i32_3 = arith.constant 0 : i32
    return %c0_i32, %c0_i32_0, %c0_i32_1, %c0_i32_2, %arg0 : i32, i32, i32, i32, i32
  }
  func.func @transform_1(%arg0: i32) -> (i32, i32, i32, i32, i32) {
    %c0_i32 = arith.constant 0 : i32
    %c0_i32_0 = arith.constant 0 : i32
    %c0_i32_1 = arith.constant 0 : i32
    %c0_i32_2 = arith.constant 0 : i32
    %c0_i32_3 = arith.constant 0 : i32
    return %c0_i32, %c0_i32_0, %c0_i32_1, %c0_i32_2, %arg0 : i32, i32, i32, i32, i32
  }
}

</mosaic_0001>

<bundles_post_ra>
// kernel: tpu_custom_call.1
= control target key start
LH: loop header
LB: loop body
LE: loop exit
PB: predicated region body
PF: predicated region fallthrough
CT: control target
= control target key end

     0   :  { %vm89_vm0 = vcmask 64512   ;;  %vm209_vm1 = vcmask 1040384   ;;  %vm211_vm2 = vcmask 1041408   ;;  %vm213_vm3 = vcmask 1042432   ;;  %s2885_s0 = inlined_call_operand.vmem [shape: f32[1,5,8,16,8], index: 0, kind: input, shape index: {}]   ;;  %s2886_s1 = inlined_call_operand.vmem [shape: f32[1,5,10,18,8], index: 1, kind: output, shape index: {}]  }
   0x1   :  { %v9_v0 = vld [vmem:[%s2885_s0 + $0x8] sm:$0xff]  ;;  %v22_v1 = vld [vmem:[%s2885_s0 + $0x70] sm:$0xff]  ;;  %vm215_vm4 = vcmask 1043456   ;;  %vm276_vm5 = vcmask 57344   ;;  %vm217_vm6 = vcmask 1044480   ;;  %vm219_vm7 = vcmask 1045504  }
   0x2   :  { %v25_v2 = vld [vmem:[%s2885_s0 + $0x88] sm:$0xff]  ;;  %818 = vst.msk [vmem:[%s2886_s1 + $0x21] sm:$0xff] %vm89_vm0, %v9_v0  ;;  %831 = vst.msk [vmem:[%s2886_s1 + $0xc1] sm:$0xff] %vm89_vm0, %v22_v1  ;;  %v38_v3 = vld [vmem:[%s2885_s0 + $0xf0] sm:$0xff]  ;;  %vm221_vm8 = vcmask 1046528   ;;  %vm781_vm9 = vcmask 58368  }
   0x3   :  { %834 = vst.msk [vmem:[%s2886_s1 + $0x111] sm:$0xff] %vm89_vm0, %v25_v2  ;;  %v41_v4 = vld [vmem:[%s2885_s0 + $0x108] sm:$0xff]  ;;  %v54_v5 = vld [vmem:[%s2885_s0 + $0x170] sm:$0xff]  ;;  %847 = vst.msk [vmem:[%s2886_s1 + $0x1b1] sm:$0xff] %vm89_vm0, %v38_v3  ;;  %v1171_v12 = vmov 0.0   ;;  %vm263_vm10 = vcmask 63488  }
   0x4   :  { %850 = vst.msk [vmem:[%s2886_s1 + $0x201] sm:$0xff] %vm89_vm0, %v41_v4  ;;  %863 = vst.msk [vmem:[%s2886_s1 + $0x2a1] sm:$0xff] %vm89_vm0, %v54_v5  ;;  %v57_v6 = vld [vmem:[%s2885_s0 + $0x188] sm:$0xff]  ;;  %v70_v7 = vld [vmem:[%s2885_s0 + $0x1f0] sm:$0xff] }
   0x5   :  { %v73_v8 = vld [vmem:[%s2885_s0 + $0x208] sm:$0xff]  ;;  %866 = vst.msk [vmem:[%s2886_s1 + $0x2f1] sm:$0xff] %vm89_vm0, %v57_v6  ;;  %879 = vst.msk [vmem:[%s2886_s1 + $0x391] sm:$0xff] %vm89_vm0, %v70_v7  ;;  %v86_v9 = vld [vmem:[%s2885_s0 + $0x270] sm:$0xff] }
   0x6   :  { %882 = vst.msk [vmem:[%s2886_s1 + $0x3e1] sm:$0xff] %vm89_vm0, %v73_v8  ;;  %v898_v10 = vld [vmem:[%s2885_s0 + $0x27f] sm:$0x1]  ;;  %v899_v11 = vld [vmem:[%s2885_s0 + $0x26f] sm:$0x1]  ;;  %895 = vst.msk [vmem:[%s2886_s1 + $0x481] sm:$0xff] %vm89_vm0, %v86_v9 }
   0x7   :  { %788 = vst.msk [vmem:[%s2886_s1 + $0x28] sm:$0x1] %vm276_vm5, %v1171_v12  ;;  %790 = vst.msk [vmem:[%s2886_s1 + $0x118] sm:$0x1] %vm276_vm5, %v1171_v12  ;;  %v900_v13 = vld [vmem:[%s2885_s0 + $0x25f] sm:$0x1] }
   0x8   :  { %792 = vst.msk [vmem:[%s2886_s1 + $0x208] sm:$0x1] %vm276_vm5, %v1171_v12  ;;  %v901_v14 = vld [vmem:[%s2885_s0 + $0x24f] sm:$0x1]  ;;  %v902_v15 = vld [vmem:[%s2885_s0 + $0x23f] sm:$0x1] }
   0x9   :  { %794 = vst.msk [vmem:[%s2886_s1 + $0x2f8] sm:$0x1] %vm276_vm5, %v1171_v12  ;;  %796 = vst.msk [vmem:[%s2886_s1 + $0x3e8] sm:$0x1] %vm276_vm5, %v1171_v12  ;;  %v903_v16 = vld [vmem:[%s2885_s0 + $0x22f] sm:$0x1] }
   0xa   :  { %v904_v17 = vld [vmem:[%s2885_s0 + $0x21f] sm:$0x1]  ;;  %v905_v18 = vld [vmem:[%s2885_s0 + $0x20f] sm:$0x1]  ;;  %v189_v19 = vrot.slane %v899_v11, 7  ;;  %v192_v20 = vrot.slane %v900_v13, 6 }
   0xb   :  { %v195_v21 = vrot.slane %v901_v14, 5  ;;  %v198_v22 = vrot.slane %v902_v15, 4  ;;  %v906_v23 = vld [vmem:[%s2885_s0 + $0xf0] sm:$0x1]  ;;  %v201_v24 = vrot.slane %v903_v16, 3  ;;  %v204_v25 = vrot.slane %v904_v17, 2 }
   0xc   :  { %v207_v26 = vrot.slane %v905_v18, 1  ;;  %v907_v27 = vld [vmem:[%s2885_s0 + $0xe0] sm:$0x1]  ;;  %v210_v29 = vsel %vm209_vm1, %v898_v10, %v189_v19  ;;  %v908_v30 = vld [vmem:[%s2885_s0 + $0xd0] sm:$0x1]  ;;  %v11_v49 = vld [vmem:[%s2885_s0 + $0x18] sm:$0xff] }
   0xd   :  { %v8_v28 = vld [vmem:[%s2885_s0] sm:$0xff]  ;;  %v910_v32 = vld [vmem:[%s2885_s0 + $0xb0] sm:$0x1]  ;;  %v212_v33 = vsel %vm211_vm2, %v210_v29, %v192_v20  ;;  %v239_v36 = vrot.slane %v907_v27, 7  ;;  %v242_v37 = vrot.slane %v908_v30, 6  ;;  %820 = vst.msk [vmem:[%s2886_s1 + $0x39] sm:$0xff] %vm89_vm0, %v11_v49 }
   0xe   :  { %v909_v31 = vld [vmem:[%s2885_s0 + $0xc0] sm:$0x1]  ;;  %817 = vst.msk [vmem:[%s2886_s1 + $0x19] sm:$0xff] %vm89_vm0, %v8_v28  ;;  %1125 = vst.msk [vmem:[%s2886_s1 + $0x4a1] sm:$0xff] %vm89_vm0, %v8_v28  ;;  %v912_v35 = vld [vmem:[%s2885_s0 + $0x90] sm:$0x1]  ;;  %v214_v38 = vsel %vm213_vm3, %v212_v33, %v195_v21 }
   0xf   :  { %v911_v34 = vld [vmem:[%s2885_s0 + $0xa0] sm:$0x1]  ;;  %v245_v39 = vrot.slane %v909_v31, 5  ;;  %v248_v40 = vrot.slane %v910_v32, 4  ;;  %v923_v42 = vld [vmem:[%s2885_s0 + $0x270] sm:$0x1]  ;;  %v216_v44 = vsel %vm215_vm4, %v214_v38, %v198_v22  ;;  %v256_v46 = vsel %vm209_vm1, %v906_v23, %v239_v36 }
  0x10   :  { %v251_v41 = vrot.slane %v911_v34, 3  ;;  %v10_v43 = vld [vmem:[%s2885_s0 + $0x10] sm:$0xff]  ;;  %v254_v45 = vrot.slane %v912_v35, 2  ;;  %931 = vst.msk [vmem:[%s2886_s1 + $0xc0] sm:$0x1] %vm276_vm5, %v923_v42  ;;  %v218_v50 = vsel %vm217_vm6, %v216_v44, %v201_v24  ;;  %v257_v51 = vsel %vm211_vm2, %v256_v46, %v242_v37  ;;  %v12_v7 = vld [vmem:[%s2885_s0 + $0x20] sm:$0xff] }
  0x11   :  { %v932_v47 = vld [vmem:[%s2885_s0 + $0x8f] sm:$0x1]  ;;  %v950_v48 = vld [vmem:[%s2885_s0 + $0x7f] sm:$0x1]  ;;  %819 = vst.msk [vmem:[%s2886_s1 + $0x31] sm:$0xff] %vm89_vm0, %v10_v43  ;;  %v220_v55 = vsel %vm219_vm7, %v218_v50, %v204_v25  ;;  %v258_v56 = vsel %vm213_vm3, %v257_v51, %v245_v39  ;;  %821 = vst.msk [vmem:[%s2886_s1 + $0x49] sm:$0xff] %vm89_vm0, %v12_v7 }
  0x12   :  { %940 = vst.msk [vmem:[%s2886_s1 + $0x41] sm:$0x1] %vm276_vm5, %v932_v47  ;;  %v951_v52 = vld [vmem:[%s2885_s0 + $0x6f] sm:$0x1]  ;;  %v952_v53 = vld [vmem:[%s2885_s0 + $0x5f] sm:$0x1]  ;;  %v222_v60 = vsel %vm221_vm8, %v220_v55, %v207_v26  ;;  %v259_v61 = vsel %vm215_vm4, %v258_v56, %v248_v40 }
  0x13   :  { %v953_v54 = vld [vmem:[%s2885_s0 + $0x4f] sm:$0x1]  ;;  %1160 = vst.msk [vmem:[%s2886_s1 + $0xc0] sm:$0x3] %vm781_vm9, %v1171_v12  ;;  %v954_v57 = vld [vmem:[%s2885_s0 + $0x3f] sm:$0x1]  ;;  %v260_v1 = vsel %vm217_vm6, %v259_v61, %v251_v41 }
  0x14   :  { %v955_v58 = vld [vmem:[%s2885_s0 + $0x2f] sm:$0x1]  ;;  %v956_v59 = vld [vmem:[%s2885_s0 + $0x1f] sm:$0x1]  ;;  %1155 = vst.msk [vmem:[%s2886_s1 + $0x41] sm:$0x1] %vm276_vm5, %v1171_v12  ;;  %v261_v8 = vsel %vm219_vm7, %v260_v1, %v254_v45 }
  0x15   :  { %v319_v62 = vld [vmem:[%s2885_s0 + $0xf] sm:$0x1]  ;;  %v321_v63 = vrot.slane %v951_v52, 7  ;;  %v324_v0 = vrot.slane %v952_v53, 6  ;;  %223 = vst.msk [vmem:[%s2886_s1 + $0x9] sm:$0xff] %vm89_vm0, %v222_v60  ;;  %v327_v2 = vrot.slane %v953_v54, 5 }
  0x16   :  { %v330_v3 = vrot.slane %v954_v57, 4  ;;  %v333_v4 = vrot.slane %v955_v58, 3  ;;  %v958_v5 = vld [vmem:[%s2885_s0 + $0x170] sm:$0x1]  ;;  %v959_v6 = vld [vmem:[%s2885_s0 + $0x160] sm:$0x1] }
  0x17   :  { %v336_v9 = vrot.slane %v956_v59, 2  ;;  %v339_v10 = vrot.slane %v319_v62, 1  ;;  %v341_v11 = vsel %vm209_vm1, %v950_v48, %v321_v63  ;;  %v960_v13 = vld [vmem:[%s2885_s0 + $0x150] sm:$0x1]  ;;  %v961_v14 = vld [vmem:[%s2885_s0 + $0x140] sm:$0x1] }
  0x18   :  { %787 = vst.msk [vmem:[%s2886_s1 + $0x10] sm:$0x1] %vm276_vm5, %v1171_v12  ;;  %v342_v15 = vsel %vm211_vm2, %v341_v11, %v324_v0  ;;  %v962_v16 = vld [vmem:[%s2885_s0 + $0x130] sm:$0x1]  ;;  %v963_v17 = vld [vmem:[%s2885_s0 + $0x120] sm:$0x1] }
  0x19   :  { %913 = vst.msk [vmem:[%s2886_s1 + $0xda] sm:$0x7f] %vm263_vm10, %v261_v8  ;;  %v964_v18 = vld [vmem:[%s2885_s0 + $0x110] sm:$0x1]  ;;  %v343_v19 = vsel %vm213_vm3, %v342_v15, %v327_v2  ;;  %v364_v20 = vrot.slane %v959_v6, 7  ;;  %v367_v21 = vrot.slane %v960_v13, 6 }
  0x1a   :  { %v370_v22 = vrot.slane %v961_v14, 5  ;;  %v975_v23 = vld [vmem:[%s2885_s0 + $0x70] sm:$0x1]  ;;  %v13_v24 = vld [vmem:[%s2885_s0 + $0x28] sm:$0xff]  ;;  %1165 = vst.msk [vmem:[%s2886_s1 + $0xda] sm:$0x1] %vm276_vm5, %v1171_v12  ;;  %v344_v25 = vsel %vm215_vm4, %v343_v19, %v330_v3 }
  0x1b   :  { %v373_v26 = vrot.slane %v962_v16, 4  ;;  %v376_v27 = vrot.slane %v963_v17, 3  ;;  %v379_v28 = vrot.slane %v964_v18, 2  ;;  %983 = vst.msk [vmem:[%s2886_s1 + $0x1b0] sm:$0x1] %vm276_vm5, %v975_v23  ;;  %v14_v30 = vld [vmem:[%s2885_s0 + $0x30] sm:$0xff]  ;;  %v345_v31 = vsel %vm217_vm6, %v344_v25, %v333_v4 }
  0x1c   :  { %v984_v29 = vld [vmem:[%s2885_s0 + $0x10f] sm:$0x1]  ;;  %822 = vst.msk [vmem:[%s2886_s1 + $0x51] sm:$0xff] %vm89_vm0, %v13_v24  ;;  %v381_v32 = vsel %vm209_vm1, %v958_v5, %v364_v20  ;;  %v1002_v33 = vld [vmem:[%s2885_s0 + $0xff] sm:$0x1]  ;;  %823 = vst.msk [vmem:[%s2886_s1 + $0x61] sm:$0xff] %vm89_vm0, %v14_v30  ;;  %v346_v36 = vsel %vm219_vm7, %v345_v31, %v336_v9 }
  0x1d   :  { %992 = vst.msk [vmem:[%s2886_s1 + $0x131] sm:$0x1] %vm276_vm5, %v984_v29  ;;  %v1003_v34 = vld [vmem:[%s2885_s0 + $0xef] sm:$0x1]  ;;  %v1004_v35 = vld [vmem:[%s2885_s0 + $0xdf] sm:$0x1]  ;;  %v382_v37 = vsel %vm211_vm2, %v381_v32, %v367_v21  ;;  %v347_v41 = vsel %vm221_vm8, %v346_v36, %v339_v10 }
  0x1e   :  { %1161 = vst.msk [vmem:[%s2886_s1 + $0x1b0] sm:$0x3] %vm781_vm9, %v1171_v12  ;;  %v1005_v38 = vld [vmem:[%s2885_s0 + $0xcf] sm:$0x1]  ;;  %v1006_v39 = vld [vmem:[%s2885_s0 + $0xbf] sm:$0x1]  ;;  %v383_v42 = vsel %vm213_vm3, %v382_v37, %v370_v22 }
  0x1f   :  { %v1007_v40 = vld [vmem:[%s2885_s0 + $0xaf] sm:$0x1]  ;;  %1156 = vst.msk [vmem:[%s2886_s1 + $0x131] sm:$0x1] %vm276_vm5, %v1171_v12  ;;  %v1008_v43 = vld [vmem:[%s2885_s0 + $0x9f] sm:$0x1]  ;;  %v384_v47 = vsel %vm215_vm4, %v383_v42, %v373_v26 }
  0x20   :  { %v1009_v44 = vld [vmem:[%s2885_s0 + $0x8f] sm:$0x1]  ;;  %v438_v45 = vrot.slane %v1003_v34, 7  ;;  %v441_v46 = vrot.slane %v1004_v35, 6  ;;  %957 = vst.msk [vmem:[%s2886_s1 + $0xf9] sm:$0xff] %vm89_vm0, %v347_v41  ;;  %v444_v48 = vrot.slane %v1005_v38, 5  ;;  %v385_v53 = vsel %vm217_vm6, %v384_v47, %v376_v27 }
  0x21   :  { %v447_v49 = vrot.slane %v1006_v39, 4  ;;  %v450_v50 = vrot.slane %v1007_v40, 3  ;;  %v1011_v51 = vld [vmem:[%s2885_s0 + $0x1f0] sm:$0x1]  ;;  %v15_v52 = vld [vmem:[%s2885_s0 + $0x38] sm:$0xff]  ;;  %v453_v54 = vrot.slane %v1008_v43, 2  ;;  %v386_v59 = vsel %vm219_vm7, %v385_v53, %v379_v28 }
  0x22   :  { %v456_v55 = vrot.slane %v1009_v44, 1  ;;  %v458_v56 = vsel %vm209_vm1, %v1002_v33, %v438_v45  ;;  %v1012_v57 = vld [vmem:[%s2885_s0 + $0x1e0] sm:$0x1]  ;;  %v1013_v58 = vld [vmem:[%s2885_s0 + $0x1d0] sm:$0x1]  ;;  %824 = vst.msk [vmem:[%s2886_s1 + $0x69] sm:$0xff] %vm89_vm0, %v15_v52 }
  0x23   :  { %789 = vst.msk [vmem:[%s2886_s1 + $0x100] sm:$0x1] %vm276_vm5, %v1171_v12  ;;  %v459_v60 = vsel %vm211_vm2, %v458_v56, %v441_v46  ;;  %v1014_v61 = vld [vmem:[%s2885_s0 + $0x1c0] sm:$0x1]  ;;  %v1015_v62 = vld [vmem:[%s2885_s0 + $0x1b0] sm:$0x1] }
  0x24   :  { %v1016_v63 = vld [vmem:[%s2885_s0 + $0x1a0] sm:$0x1]  ;;  %965 = vst.msk [vmem:[%s2886_s1 + $0x1ca] sm:$0x7f] %vm263_vm10, %v386_v59  ;;  %v460_v0 = vsel %vm213_vm3, %v459_v60, %v444_v48  ;;  %v1017_v1 = vld [vmem:[%s2885_s0 + $0x190] sm:$0x1] }
  0x25   :  { %v481_v2 = vrot.slane %v1012_v57, 7  ;;  %v484_v3 = vrot.slane %v1013_v58, 6  ;;  %v487_v4 = vrot.slane %v1014_v61, 5  ;;  %v16_v5 = vld [vmem:[%s2885_s0 + $0x40] sm:$0xff]  ;;  %v461_v6 = vsel %vm215_vm4, %v460_v0, %v447_v49  ;;  %v1028_v10 = vld [vmem:[%s2885_s0 + $0xf0] sm:$0x1] }
  0x26   :  { %v490_v7 = vrot.slane %v1015_v62, 4  ;;  %v493_v8 = vrot.slane %v1016_v63, 3  ;;  %v496_v9 = vrot.slane %v1017_v1, 2  ;;  %825 = vst.msk [vmem:[%s2886_s1 + $0x79] sm:$0xff] %vm89_vm0, %v16_v5  ;;  %v17_v11 = vld [vmem:[%s2885_s0 + $0x48] sm:$0xff]  ;;  %v462_v13 = vsel %vm217_vm6, %v461_v6, %v450_v50  ;;  %v18_v33 = vld [vmem:[%s2885_s0 + $0x50] sm:$0xff] }
  0x27   :  { %1166 = vst.msk [vmem:[%s2886_s1 + $0x1ca] sm:$0x1] %vm276_vm5, %v1171_v12  ;;  %v498_v14 = vsel %vm209_vm1, %v1011_v51, %v481_v2  ;;  %1036 = vst.msk [vmem:[%s2886_s1 + $0x2a0] sm:$0x1] %vm276_vm5, %v1028_v10  ;;  %v1037_v15 = vld [vmem:[%s2885_s0 + $0x18f] sm:$0x1]  ;;  %v463_v18 = vsel %vm219_vm7, %v462_v13, %v453_v54 }
  0x28   :  { %v1055_v16 = vld [vmem:[%s2885_s0 + $0x17f] sm:$0x1]  ;;  %v1056_v17 = vld [vmem:[%s2885_s0 + $0x16f] sm:$0x1]  ;;  %826 = vst.msk [vmem:[%s2886_s1 + $0x81] sm:$0xff] %vm89_vm0, %v17_v11  ;;  %v499_v19 = vsel %vm211_vm2, %v498_v14, %v484_v3  ;;  %v464_v23 = vsel %vm221_vm8, %v463_v18, %v456_v55  ;;  %827 = vst.msk [vmem:[%s2886_s1 + $0x91] sm:$0xff] %vm89_vm0, %v18_v33 }
  0x29   :  { %1045 = vst.msk [vmem:[%s2886_s1 + $0x221] sm:$0x1] %vm276_vm5, %v1037_v15  ;;  %v1057_v20 = vld [vmem:[%s2885_s0 + $0x15f] sm:$0x1]  ;;  %v1058_v21 = vld [vmem:[%s2885_s0 + $0x14f] sm:$0x1]  ;;  %v500_v24 = vsel %vm213_vm3, %v499_v19, %v487_v4 }
  0x2a   :  { %v1059_v22 = vld [vmem:[%s2885_s0 + $0x13f] sm:$0x1]  ;;  %1162 = vst.msk [vmem:[%s2886_s1 + $0x2a0] sm:$0x3] %vm781_vm9, %v1171_v12  ;;  %v1060_v25 = vld [vmem:[%s2885_s0 + $0x12f] sm:$0x1]  ;;  %v501_v28 = vsel %vm215_vm4, %v500_v24, %v490_v7 }
  0x2b   :  { %v1061_v26 = vld [vmem:[%s2885_s0 + $0x11f] sm:$0x1]  ;;  %v1062_v27 = vld [vmem:[%s2885_s0 + $0x10f] sm:$0x1]  ;;  %1157 = vst.msk [vmem:[%s2886_s1 + $0x221] sm:$0x1] %vm276_vm5, %v1171_v12  ;;  %v502_v34 = vsel %vm217_vm6, %v501_v28, %v493_v8 }
  0x2c   :  { %1010 = vst.msk [vmem:[%s2886_s1 + $0x1e9] sm:$0xff] %vm89_vm0, %v464_v23  ;;  %v555_v29 = vrot.slane %v1056_v17, 7  ;;  %v558_v30 = vrot.slane %v1057_v20, 6  ;;  %v561_v31 = vrot.slane %v1058_v21, 5  ;;  %v1064_v32 = vld [vmem:[%s2885_s0 + $0x270] sm:$0x1]  ;;  %v503_v40 = vsel %vm219_vm7, %v502_v34, %v496_v9 }
  0x2d   :  { %v564_v35 = vrot.slane %v1059_v22, 4  ;;  %v567_v36 = vrot.slane %v1060_v25, 3  ;;  %v570_v37 = vrot.slane %v1061_v26, 2  ;;  %v1065_v38 = vld [vmem:[%s2885_s0 + $0x260] sm:$0x1]  ;;  %v19_v39 = vld [vmem:[%s2885_s0 + $0x58] sm:$0xff] }
  0x2e   :  { %791 = vst.msk [vmem:[%s2886_s1 + $0x1f0] sm:$0x1] %vm276_vm5, %v1171_v12  ;;  %v573_v41 = vrot.slane %v1062_v27, 1  ;;  %v575_v42 = vsel %vm209_vm1, %v1055_v16, %v555_v29  ;;  %v1066_v43 = vld [vmem:[%s2885_s0 + $0x250] sm:$0x1]  ;;  %v591_v45 = vrot.slane %v1065_v38, 7 }
  0x2f   :  { %v1067_v44 = vld [vmem:[%s2885_s0 + $0x240] sm:$0x1]  ;;  %828 = vst.msk [vmem:[%s2886_s1 + $0x99] sm:$0xff] %vm89_vm0, %v19_v39  ;;  %v576_v46 = vsel %vm211_vm2, %v575_v42, %v558_v30  ;;  %v1068_v47 = vld [vmem:[%s2885_s0 + $0x230] sm:$0x1]  ;;  %v594_v51 = vrot.slane %v1066_v43, 6 }
  0x30   :  { %1018 = vst.msk [vmem:[%s2886_s1 + $0x2ba] sm:$0x7f] %vm263_vm10, %v503_v40  ;;  %v1069_v48 = vld [vmem:[%s2885_s0 + $0x220] sm:$0x1]  ;;  %v1070_v49 = vld [vmem:[%s2885_s0 + $0x210] sm:$0x1]  ;;  %v577_v50 = vsel %vm213_vm3, %v576_v46, %v561_v31  ;;  %v608_v59 = vsel %vm209_vm1, %v1064_v32, %v591_v45 }
  0x31   :  { %v597_v52 = vrot.slane %v1067_v44, 5  ;;  %v600_v53 = vrot.slane %v1068_v47, 4  ;;  %v1081_v54 = vld [vmem:[%s2885_s0 + $0x170] sm:$0x1]  ;;  %v20_v55 = vld [vmem:[%s2885_s0 + $0x60] sm:$0xff]  ;;  %v578_v56 = vsel %vm215_vm4, %v577_v50, %v564_v35  ;;  %v603_v57 = vrot.slane %v1069_v48, 3 }
  0x32   :  { %1167 = vst.msk [vmem:[%s2886_s1 + $0x2ba] sm:$0x1] %vm276_vm5, %v1171_v12  ;;  %v606_v58 = vrot.slane %v1070_v49, 2  ;;  %1089 = vst.msk [vmem:[%s2886_s1 + $0x390] sm:$0x1] %vm276_vm5, %v1081_v54  ;;  %v579_v62 = vsel %vm217_vm6, %v578_v56, %v567_v36  ;;  %v609_v63 = vsel %vm211_vm2, %v608_v59, %v594_v51  ;;  %v21_v20 = vld [vmem:[%s2885_s0 + $0x68] sm:$0xff] }
  0x33   :  { %v1090_v60 = vld [vmem:[%s2885_s0 + $0x20f] sm:$0x1]  ;;  %v1108_v61 = vld [vmem:[%s2885_s0 + $0x1ff] sm:$0x1]  ;;  %829 = vst.msk [vmem:[%s2886_s1 + $0xa9] sm:$0xff] %vm89_vm0, %v20_v55  ;;  %v580_v3 = vsel %vm219_vm7, %v579_v62, %v570_v37  ;;  %v610_v4 = vsel %vm213_vm3, %v609_v63, %v597_v52  ;;  %830 = vst.msk [vmem:[%s2886_s1 + $0xb1] sm:$0xff] %vm89_vm0, %v21_v20 }
  0x34   :  { %1098 = vst.msk [vmem:[%s2886_s1 + $0x311] sm:$0x1] %vm276_vm5, %v1090_v60  ;;  %v1109_v0 = vld [vmem:[%s2885_s0 + $0x1ef] sm:$0x1]  ;;  %v1110_v1 = vld [vmem:[%s2885_s0 + $0x1df] sm:$0x1]  ;;  %v581_v8 = vsel %vm221_vm8, %v580_v3, %v573_v41  ;;  %v611_v9 = vsel %vm215_vm4, %v610_v4, %v600_v53 }
  0x35   :  { %v1111_v2 = vld [vmem:[%s2885_s0 + $0x1cf] sm:$0x1]  ;;  %1163 = vst.msk [vmem:[%s2886_s1 + $0x390] sm:$0x3] %vm781_vm9, %v1171_v12  ;;  %v1112_v5 = vld [vmem:[%s2885_s0 + $0x1bf] sm:$0x1]  ;;  %v612_v14 = vsel %vm217_vm6, %v611_v9, %v603_v57 }
  0x36   :  { %v1113_v6 = vld [vmem:[%s2885_s0 + $0x1af] sm:$0x1]  ;;  %v1114_v7 = vld [vmem:[%s2885_s0 + $0x19f] sm:$0x1]  ;;  %1158 = vst.msk [vmem:[%s2886_s1 + $0x311] sm:$0x1] %vm276_vm5, %v1171_v12  ;;  %v613_v21 = vsel %vm219_vm7, %v612_v14, %v606_v58 }
  0x37   :  { %v1115_v10 = vld [vmem:[%s2885_s0 + $0x18f] sm:$0x1]  ;;  %v664_v11 = vrot.slane %v1109_v0, 7  ;;  %v667_v13 = vrot.slane %v1110_v1, 6  ;;  %1063 = vst.msk [vmem:[%s2886_s1 + $0x2d9] sm:$0xff] %vm89_vm0, %v581_v8  ;;  %v670_v15 = vrot.slane %v1111_v2, 5 }
  0x38   :  { %v673_v16 = vrot.slane %v1112_v5, 4  ;;  %v676_v17 = vrot.slane %v1113_v6, 3  ;;  %v1117_v18 = vld [vmem:[%s2885_s0 + $0x70] sm:$0x1]  ;;  %v1118_v19 = vld [vmem:[%s2885_s0 + $0x60] sm:$0x1] }
  0x39   :  { %v679_v22 = vrot.slane %v1114_v7, 2  ;;  %v682_v23 = vrot.slane %v1115_v10, 1  ;;  %v684_v24 = vsel %vm209_vm1, %v1108_v61, %v664_v11  ;;  %v1119_v25 = vld [vmem:[%s2885_s0 + $0x50] sm:$0x1]  ;;  %v1120_v26 = vld [vmem:[%s2885_s0 + $0x40] sm:$0x1] }
  0x3a   :  { %793 = vst.msk [vmem:[%s2886_s1 + $0x2e0] sm:$0x1] %vm276_vm5, %v1171_v12  ;;  %v685_v27 = vsel %vm211_vm2, %v684_v24, %v667_v13  ;;  %v1121_v28 = vld [vmem:[%s2885_s0 + $0x30] sm:$0x1]  ;;  %v1122_v29 = vld [vmem:[%s2885_s0 + $0x20] sm:$0x1] }
  0x3b   :  { %1071 = vst.msk [vmem:[%s2886_s1 + $0x3aa] sm:$0x7f] %vm263_vm10, %v613_v21  ;;  %v1123_v30 = vld [vmem:[%s2885_s0 + $0x10] sm:$0x1]  ;;  %v686_v31 = vsel %vm213_vm3, %v685_v27, %v670_v15  ;;  %v700_v32 = vrot.slane %v1118_v19, 7  ;;  %v703_v33 = vrot.slane %v1119_v25, 6  ;;  %v777_v21 = vlaneseq }
  0x3c   :  { %v706_v34 = vrot.slane %v1120_v26, 5  ;;  %v1133_v35 = vld [vmem:[%s2885_s0 + $0x1f0] sm:$0x1]  ;;  %v23_v36 = vld [vmem:[%s2885_s0 + $0x78] sm:$0xff]  ;;  %1168 = vst.msk [vmem:[%s2886_s1 + $0x3aa] sm:$0x1] %vm276_vm5, %v1171_v12  ;;  %v687_v37 = vsel %vm215_vm4, %v686_v31, %v673_v16 }
  0x3d   :  { %v709_v38 = vrot.slane %v1121_v28, 4  ;;  %1141 = vst.msk [vmem:[%s2886_s1 + $0x480] sm:$0x1] %vm276_vm5, %v1133_v35  ;;  %v744_v39 = vld [vmem:[%s2885_s0 + $0xf] sm:$0x1]  ;;  %v24_v40 = vld [vmem:[%s2885_s0 + $0x80] sm:$0xff]  ;;  %v688_v41 = vsel %vm217_vm6, %v687_v37, %v676_v17  ;;  %v717_v43 = vsel %vm209_vm1, %v1117_v18, %v700_v32 }
  0x3e   :  { %832 = vst.msk [vmem:[%s2886_s1 + $0xc9] sm:$0xff] %vm89_vm0, %v23_v36  ;;  %949 = vst.msk [vmem:[%s2886_s1 + $0xf1] sm:$0xff] %vm89_vm0, %v23_v36  ;;  %v712_v42 = vrot.slane %v1122_v29, 3  ;;  %v26_v44 = vld [vmem:[%s2885_s0 + $0x90] sm:$0xff]  ;;  %v27_v45 = vld [vmem:[%s2885_s0 + $0x98] sm:$0xff]  ;;  %v689_v47 = vsel %vm219_vm7, %v688_v41, %v679_v22  ;;  %v715_v48 = vrot.slane %v1123_v30, 2  ;;  %v718_v49 = vsel %vm211_vm2, %v717_v43, %v703_v33 }
  0x3f   :  { %1142 = vst.msk [vmem:[%s2886_s1 + $0x401] sm:$0x1] %vm276_vm5, %v744_v39  ;;  %v28_v46 = vld [vmem:[%s2885_s0 + $0xa0] sm:$0xff]  ;;  %v29_v50 = vld [vmem:[%s2885_s0 + $0xa8] sm:$0xff]  ;;  %v30_v51 = vld [vmem:[%s2885_s0 + $0xb0] sm:$0xff]  ;;  %v690_v53 = vsel %vm221_vm8, %v689_v47, %v682_v23  ;;  %v719_v54 = vsel %vm213_vm3, %v718_v49, %v706_v34  ;;  %v2221_v34 = vshrl.u32 %v777_v21, 7 }
  0x40   :  { %833 = vst.msk [vmem:[%s2886_s1 + $0x109] sm:$0xff] %vm89_vm0, %v24_v40  ;;  %915 = vst.msk [vmem:[%s2886_s1 + $0xe1] sm:$0xff] %vm89_vm0, %v24_v40  ;;  %v31_v52 = vld [vmem:[%s2885_s0 + $0xb8] sm:$0xff]  ;;  %v32_v55 = vld [vmem:[%s2885_s0 + $0xc0] sm:$0xff]  ;;  %v720_v58 = vsel %vm215_vm4, %v719_v54, %v709_v38 }
  0x41   :  { %1164 = vst.msk [vmem:[%s2886_s1 + $0x480] sm:$0x3] %vm781_vm9, %v1171_v12  ;;  %v33_v56 = vld [vmem:[%s2885_s0 + $0xc8] sm:$0xff]  ;;  %v34_v57 = vld [vmem:[%s2885_s0 + $0xd0] sm:$0xff]  ;;  %v35_v59 = vld [vmem:[%s2885_s0 + $0xd8] sm:$0xff]  ;;  %v721_v62 = vsel %vm217_vm6, %v720_v58, %v712_v42  ;;  %v779_v47 = vsub.s32 0, %v2221_v34 }
  0x42   :  { %835 = vst.msk [vmem:[%s2886_s1 + $0x121] sm:$0xff] %vm89_vm0, %v26_v44  ;;  %836 = vst.msk [vmem:[%s2886_s1 + $0x129] sm:$0xff] %vm89_vm0, %v27_v45  ;;  %v36_v60 = vld [vmem:[%s2885_s0 + $0xe0] sm:$0xff]  ;;  %v37_v61 = vld [vmem:[%s2885_s0 + $0xe8] sm:$0xff]  ;;  %v722_v2 = vsel %vm219_vm7, %v721_v62, %v715_v48 }
  0x43   :  { %837 = vst.msk [vmem:[%s2886_s1 + $0x139] sm:$0xff] %vm89_vm0, %v28_v46  ;;  %838 = vst.msk [vmem:[%s2886_s1 + $0x141] sm:$0xff] %vm89_vm0, %v29_v50  ;;  %v39_v63 = vld [vmem:[%s2885_s0 + $0xf8] sm:$0xff]  ;;  %v40_v0 = vld [vmem:[%s2885_s0 + $0x100] sm:$0xff] }
  0x44   :  { %1159 = vst.msk [vmem:[%s2886_s1 + $0x401] sm:$0x1] %vm276_vm5, %v1171_v12  ;;  %v42_v1 = vld [vmem:[%s2885_s0 + $0x110] sm:$0xff]  ;;  %v43_v3 = vld [vmem:[%s2885_s0 + $0x118] sm:$0xff]  ;;  %v44_v4 = vld [vmem:[%s2885_s0 + $0x120] sm:$0xff] }
  0x45   :  { %839 = vst.msk [vmem:[%s2886_s1 + $0x151] sm:$0xff] %vm89_vm0, %v30_v51  ;;  %840 = vst.msk [vmem:[%s2886_s1 + $0x159] sm:$0xff] %vm89_vm0, %v31_v52  ;;  %v45_v5 = vld [vmem:[%s2885_s0 + $0x128] sm:$0xff]  ;;  %v46_v6 = vld [vmem:[%s2885_s0 + $0x130] sm:$0xff] }
  0x46   :  { %1116 = vst.msk [vmem:[%s2886_s1 + $0x3c9] sm:$0xff] %vm89_vm0, %v690_v53  ;;  %841 = vst.msk [vmem:[%s2886_s1 + $0x169] sm:$0xff] %vm89_vm0, %v32_v55  ;;  %v47_v7 = vld [vmem:[%s2885_s0 + $0x138] sm:$0xff]  ;;  %v48_v8 = vld [vmem:[%s2885_s0 + $0x140] sm:$0xff] }
  0x47   :  { %842 = vst.msk [vmem:[%s2886_s1 + $0x171] sm:$0xff] %vm89_vm0, %v33_v56  ;;  %843 = vst.msk [vmem:[%s2886_s1 + $0x181] sm:$0xff] %vm89_vm0, %v34_v57  ;;  %v49_v9 = vld [vmem:[%s2885_s0 + $0x148] sm:$0xff]  ;;  %v50_v10 = vld [vmem:[%s2885_s0 + $0x150] sm:$0xff] }
  0x48   :  { %844 = vst.msk [vmem:[%s2886_s1 + $0x189] sm:$0xff] %vm89_vm0, %v35_v59  ;;  %845 = vst.msk [vmem:[%s2886_s1 + $0x199] sm:$0xff] %vm89_vm0, %v36_v60  ;;  %v51_v11 = vld [vmem:[%s2885_s0 + $0x158] sm:$0xff]  ;;  %v52_v13 = vld [vmem:[%s2885_s0 + $0x160] sm:$0xff] }
  0x49   :  { %846 = vst.msk [vmem:[%s2886_s1 + $0x1a1] sm:$0xff] %vm89_vm0, %v37_v61  ;;  %848 = vst.msk [vmem:[%s2886_s1 + $0x1b9] sm:$0xff] %vm89_vm0, %v39_v63  ;;  %v55_v14 = vld [vmem:[%s2885_s0 + $0x178] sm:$0xff]  ;;  %v56_v15 = vld [vmem:[%s2885_s0 + $0x180] sm:$0xff] }
  0x4a   :  { %795 = vst.msk [vmem:[%s2886_s1 + $0x3d0] sm:$0x1] %vm276_vm5, %v1171_v12  ;;  %v58_v16 = vld [vmem:[%s2885_s0 + $0x190] sm:$0xff]  ;;  %v59_v17 = vld [vmem:[%s2885_s0 + $0x198] sm:$0xff]  ;;  %v60_v18 = vld [vmem:[%s2885_s0 + $0x1a0] sm:$0xff] }
  0x4b   :  { %849 = vst.msk [vmem:[%s2886_s1 + $0x1f9] sm:$0xff] %vm89_vm0, %v40_v0  ;;  %851 = vst.msk [vmem:[%s2886_s1 + $0x211] sm:$0xff] %vm89_vm0, %v42_v1  ;;  %v61_v19 = vld [vmem:[%s2885_s0 + $0x1a8] sm:$0xff]  ;;  %v62_v20 = vld [vmem:[%s2885_s0 + $0x1b0] sm:$0xff] }
  0x4c   :  { %967 = vst.msk [vmem:[%s2886_s1 + $0x1d1] sm:$0xff] %vm89_vm0, %v40_v0  ;;  %1001 = vst.msk [vmem:[%s2886_s1 + $0x1e1] sm:$0xff] %vm89_vm0, %v39_v63  ;;  %v63_v22 = vld [vmem:[%s2885_s0 + $0x1b8] sm:$0xff]  ;;  %v64_v23 = vld [vmem:[%s2885_s0 + $0x1c0] sm:$0xff] }
  0x4d   :  { %1124 = vst.msk [vmem:[%s2886_s1 + $0x49a] sm:$0x7f] %vm263_vm10, %v722_v2  ;;  %v65_v24 = vld [vmem:[%s2885_s0 + $0x1c8] sm:$0xff]  ;;  %v66_v25 = vld [vmem:[%s2885_s0 + $0x1d0] sm:$0xff]  ;;  %v67_v26 = vld [vmem:[%s2885_s0 + $0x1d8] sm:$0xff] }
  0x4e   :  { %852 = vst.msk [vmem:[%s2886_s1 + $0x219] sm:$0xff] %vm89_vm0, %v43_v3  ;;  %853 = vst.msk [vmem:[%s2886_s1 + $0x229] sm:$0xff] %vm89_vm0, %v44_v4  ;;  %v68_v27 = vld [vmem:[%s2885_s0 + $0x1e0] sm:$0xff]  ;;  %v69_v28 = vld [vmem:[%s2885_s0 + $0x1e8] sm:$0xff] }
  0x4f   :  { %854 = vst.msk [vmem:[%s2886_s1 + $0x231] sm:$0xff] %vm89_vm0, %v45_v5  ;;  %855 = vst.msk [vmem:[%s2886_s1 + $0x241] sm:$0xff] %vm89_vm0, %v46_v6  ;;  %v71_v29 = vld [vmem:[%s2885_s0 + $0x1f8] sm:$0xff]  ;;  %v72_v30 = vld [vmem:[%s2885_s0 + $0x200] sm:$0xff] }
  0x50   :  { %856 = vst.msk [vmem:[%s2886_s1 + $0x249] sm:$0xff] %vm89_vm0, %v47_v7  ;;  %857 = vst.msk [vmem:[%s2886_s1 + $0x259] sm:$0xff] %vm89_vm0, %v48_v8  ;;  %v74_v31 = vld [vmem:[%s2885_s0 + $0x210] sm:$0xff]  ;;  %v75_v32 = vld [vmem:[%s2885_s0 + $0x218] sm:$0xff] }
  0x51   :  { %1169 = vst.msk [vmem:[%s2886_s1 + $0x49a] sm:$0x1] %vm276_vm5, %v1171_v12  ;;  %v53_v12 = vld [vmem:[%s2885_s0 + $0x168] sm:$0xff]  ;;  %v76_v33 = vld [vmem:[%s2885_s0 + $0x220] sm:$0xff]  ;;  %v78_v36 = vld [vmem:[%s2885_s0 + $0x230] sm:$0xff] }
  0x52   :  { %858 = vst.msk [vmem:[%s2886_s1 + $0x261] sm:$0xff] %vm89_vm0, %v49_v9  ;;  %859 = vst.msk [vmem:[%s2886_s1 + $0x271] sm:$0xff] %vm89_vm0, %v50_v10  ;;  %v77_v35 = vld [vmem:[%s2885_s0 + $0x228] sm:$0xff]  ;;  %v79_v37 = vld [vmem:[%s2885_s0 + $0x238] sm:$0xff] }
  0x53   :  { %860 = vst.msk [vmem:[%s2886_s1 + $0x279] sm:$0xff] %vm89_vm0, %v51_v11  ;;  %861 = vst.msk [vmem:[%s2886_s1 + $0x289] sm:$0xff] %vm89_vm0, %v52_v13  ;;  %v80_v38 = vld [vmem:[%s2885_s0 + $0x240] sm:$0xff]  ;;  %v81_v39 = vld [vmem:[%s2885_s0 + $0x248] sm:$0xff] }
  0x54   :  { %862 = vst.msk [vmem:[%s2886_s1 + $0x291] sm:$0xff] %vm89_vm0, %v53_v12  ;;  %864 = vst.msk [vmem:[%s2886_s1 + $0x2a9] sm:$0xff] %vm89_vm0, %v55_v14  ;;  %v82_v40 = vld [vmem:[%s2885_s0 + $0x250] sm:$0xff]  ;;  %v83_v41 = vld [vmem:[%s2885_s0 + $0x258] sm:$0xff] }
  0x55   :  { %1054 = vst.msk [vmem:[%s2886_s1 + $0x2d1] sm:$0xff] %vm89_vm0, %v55_v14  ;;  %865 = vst.msk [vmem:[%s2886_s1 + $0x2e9] sm:$0xff] %vm89_vm0, %v56_v15  ;;  %v84_v42 = vld [vmem:[%s2885_s0 + $0x260] sm:$0xff]  ;;  %v85_v43 = vld [vmem:[%s2885_s0 + $0x268] sm:$0xff] }
  0x56   :  { %867 = vst.msk [vmem:[%s2886_s1 + $0x301] sm:$0xff] %vm89_vm0, %v58_v16  ;;  %868 = vst.msk [vmem:[%s2886_s1 + $0x309] sm:$0xff] %vm89_vm0, %v59_v17  ;;  %v87_v44 = vld [vmem:[%s2885_s0 + $0x278] sm:$0xff]  ;;  %v916_v45 = vld [vmem:[%s2885_s0 + $0x277] sm:$0x1] }
  0x57   :  { %1020 = vst.msk [vmem:[%s2886_s1 + $0x2c1] sm:$0xff] %vm89_vm0, %v56_v15  ;;  %869 = vst.msk [vmem:[%s2886_s1 + $0x319] sm:$0xff] %vm89_vm0, %v60_v18  ;;  %v917_v46 = vld [vmem:[%s2885_s0 + $0x276] sm:$0x1]  ;;  %v918_v48 = vld [vmem:[%s2885_s0 + $0x275] sm:$0x1] }
  0x58   :  { %870 = vst.msk [vmem:[%s2886_s1 + $0x321] sm:$0xff] %vm89_vm0, %v61_v19  ;;  %871 = vst.msk [vmem:[%s2886_s1 + $0x331] sm:$0xff] %vm89_vm0, %v62_v20  ;;  %v919_v49 = vld [vmem:[%s2885_s0 + $0x274] sm:$0x1]  ;;  %v920_v50 = vld [vmem:[%s2885_s0 + $0x273] sm:$0x1] }
  0x59   :  { %872 = vst.msk [vmem:[%s2886_s1 + $0x339] sm:$0xff] %vm89_vm0, %v63_v22  ;;  %873 = vst.msk [vmem:[%s2886_s1 + $0x349] sm:$0xff] %vm89_vm0, %v64_v23  ;;  %v921_v51 = vld [vmem:[%s2885_s0 + $0x272] sm:$0x1]  ;;  %v922_v52 = vld [vmem:[%s2885_s0 + $0x271] sm:$0x1] }
  0x5a   :  { %874 = vst.msk [vmem:[%s2886_s1 + $0x351] sm:$0xff] %vm89_vm0, %v65_v24  ;;  %875 = vst.msk [vmem:[%s2886_s1 + $0x361] sm:$0xff] %vm89_vm0, %v66_v25  ;;  %v933_v53 = vld [vmem:[%s2885_s0 + $0x8e] sm:$0x1]  ;;  %v934_v54 = vld [vmem:[%s2885_s0 + $0x8d] sm:$0x1] }
  0x5b   :  { %876 = vst.msk [vmem:[%s2886_s1 + $0x369] sm:$0xff] %vm89_vm0, %v67_v26  ;;  %877 = vst.msk [vmem:[%s2886_s1 + $0x379] sm:$0xff] %vm89_vm0, %v68_v27  ;;  %v935_v55 = vld [vmem:[%s2885_s0 + $0x8c] sm:$0x1]  ;;  %v936_v56 = vld [vmem:[%s2885_s0 + $0x8b] sm:$0x1] }
  0x5c   :  { %878 = vst.msk [vmem:[%s2886_s1 + $0x381] sm:$0xff] %vm89_vm0, %v69_v28  ;;  %880 = vst.msk [vmem:[%s2886_s1 + $0x399] sm:$0xff] %vm89_vm0, %v71_v29  ;;  %v937_v57 = vld [vmem:[%s2885_s0 + $0x8a] sm:$0x1]  ;;  %v938_v58 = vld [vmem:[%s2885_s0 + $0x89] sm:$0x1] }
  0x5d   :  { %881 = vst.msk [vmem:[%s2886_s1 + $0x3d9] sm:$0xff] %vm89_vm0, %v72_v30  ;;  %1073 = vst.msk [vmem:[%s2886_s1 + $0x3b1] sm:$0xff] %vm89_vm0, %v72_v30  ;;  %v939_v59 = vld [vmem:[%s2885_s0 + $0x88] sm:$0x1]  ;;  %v968_v60 = vld [vmem:[%s2885_s0 + $0x77] sm:$0x1] }
  0x5e   :  { %1107 = vst.msk [vmem:[%s2886_s1 + $0x3c1] sm:$0xff] %vm89_vm0, %v71_v29  ;;  %883 = vst.msk [vmem:[%s2886_s1 + $0x3f1] sm:$0xff] %vm89_vm0, %v74_v31  ;;  %v969_v61 = vld [vmem:[%s2885_s0 + $0x76] sm:$0x1]  ;;  %v970_v62 = vld [vmem:[%s2885_s0 + $0x75] sm:$0x1] }
  0x5f   :  { %884 = vst.msk [vmem:[%s2886_s1 + $0x3f9] sm:$0xff] %vm89_vm0, %v75_v32  ;;  %885 = vst.msk [vmem:[%s2886_s1 + $0x409] sm:$0xff] %vm89_vm0, %v76_v33  ;;  %v971_v63 = vld [vmem:[%s2885_s0 + $0x74] sm:$0x1]  ;;  %v972_v0 = vld [vmem:[%s2885_s0 + $0x73] sm:$0x1] }
  0x60   :  { %886 = vst.msk [vmem:[%s2886_s1 + $0x411] sm:$0xff] %vm89_vm0, %v77_v35  ;;  %887 = vst.msk [vmem:[%s2886_s1 + $0x421] sm:$0xff] %vm89_vm0, %v78_v36  ;;  %v973_v1 = vld [vmem:[%s2885_s0 + $0x72] sm:$0x1]  ;;  %v974_v2 = vld [vmem:[%s2885_s0 + $0x71] sm:$0x1] }
  0x61   :  { %888 = vst.msk [vmem:[%s2886_s1 + $0x429] sm:$0xff] %vm89_vm0, %v79_v37  ;;  %889 = vst.msk [vmem:[%s2886_s1 + $0x439] sm:$0xff] %vm89_vm0, %v80_v38  ;;  %v985_v3 = vld [vmem:[%s2885_s0 + $0x10e] sm:$0x1]  ;;  %v986_v4 = vld [vmem:[%s2885_s0 + $0x10d] sm:$0x1] }
  0x62   :  { %890 = vst.msk [vmem:[%s2886_s1 + $0x441] sm:$0xff] %vm89_vm0, %v81_v39  ;;  %891 = vst.msk [vmem:[%s2886_s1 + $0x451] sm:$0xff] %vm89_vm0, %v82_v40  ;;  %v987_v5 = vld [vmem:[%s2885_s0 + $0x10c] sm:$0x1]  ;;  %v988_v6 = vld [vmem:[%s2885_s0 + $0x10b] sm:$0x1] }
  0x63   :  { %892 = vst.msk [vmem:[%s2886_s1 + $0x459] sm:$0xff] %vm89_vm0, %v83_v41  ;;  %893 = vst.msk [vmem:[%s2886_s1 + $0x469] sm:$0xff] %vm89_vm0, %v84_v42  ;;  %v989_v7 = vld [vmem:[%s2885_s0 + $0x10a] sm:$0x1]  ;;  %v990_v8 = vld [vmem:[%s2885_s0 + $0x109] sm:$0x1] }
  0x64   :  { %894 = vst.msk [vmem:[%s2886_s1 + $0x471] sm:$0xff] %vm89_vm0, %v85_v43  ;;  %896 = vst.msk [vmem:[%s2886_s1 + $0x489] sm:$0xff] %vm89_vm0, %v87_v44  ;;  %v991_v9 = vld [vmem:[%s2885_s0 + $0x108] sm:$0x1]  ;;  %v1021_v10 = vld [vmem:[%s2885_s0 + $0xf7] sm:$0x1] }
  0x65   :  { %172 = vst.msk [vmem:[%s2886_s1 + $0x1] sm:$0xff] %vm89_vm0, %v87_v44  ;;  %v1022_v11 = vld [vmem:[%s2885_s0 + $0xf6] sm:$0x1]  ;;  %v1023_v13 = vld [vmem:[%s2885_s0 + $0xf5] sm:$0x1] }
  0x66   :  { %924 = vst.msk [vmem:[%s2886_s1 + $0x18] sm:$0x1] %vm276_vm5, %v916_v45  ;;  %925 = vst.msk [vmem:[%s2886_s1 + $0x30] sm:$0x1] %vm276_vm5, %v917_v46  ;;  %v1024_v12 = vld [vmem:[%s2885_s0 + $0xf4] sm:$0x1] }
  0x67   :  { %926 = vst.msk [vmem:[%s2886_s1 + $0x48] sm:$0x1] %vm276_vm5, %v918_v48  ;;  %927 = vst.msk [vmem:[%s2886_s1 + $0x60] sm:$0x1] %vm276_vm5, %v919_v49  ;;  %v1025_v14 = vld [vmem:[%s2885_s0 + $0xf3] sm:$0x1] }
  0x68   :  { %928 = vst.msk [vmem:[%s2886_s1 + $0x78] sm:$0x1] %vm276_vm5, %v920_v50  ;;  %929 = vst.msk [vmem:[%s2886_s1 + $0x90] sm:$0x1] %vm276_vm5, %v921_v51  ;;  %v1026_v15 = vld [vmem:[%s2885_s0 + $0xf2] sm:$0x1] }
  0x69   :  { %930 = vst.msk [vmem:[%s2886_s1 + $0xa8] sm:$0x1] %vm276_vm5, %v922_v52  ;;  %941 = vst.msk [vmem:[%s2886_s1 + $0x59] sm:$0x1] %vm276_vm5, %v933_v53  ;;  %v1027_v16 = vld [vmem:[%s2885_s0 + $0xf1] sm:$0x1] }
  0x6a   :  { %942 = vst.msk [vmem:[%s2886_s1 + $0x71] sm:$0x1] %vm276_vm5, %v934_v54  ;;  %943 = vst.msk [vmem:[%s2886_s1 + $0x89] sm:$0x1] %vm276_vm5, %v935_v55  ;;  %v1038_v17 = vld [vmem:[%s2885_s0 + $0x18e] sm:$0x1] }
  0x6b   :  { %944 = vst.msk [vmem:[%s2886_s1 + $0xa1] sm:$0x1] %vm276_vm5, %v936_v56  ;;  %945 = vst.msk [vmem:[%s2886_s1 + $0xb9] sm:$0x1] %vm276_vm5, %v937_v57  ;;  %v1039_v18 = vld [vmem:[%s2885_s0 + $0x18d] sm:$0x1] }
  0x6c   :  { %946 = vst.msk [vmem:[%s2886_s1 + $0xd1] sm:$0x1] %vm276_vm5, %v938_v58  ;;  %947 = vst.msk [vmem:[%s2886_s1 + $0xe9] sm:$0x1] %vm276_vm5, %v939_v59  ;;  %v1040_v19 = vld [vmem:[%s2885_s0 + $0x18c] sm:$0x1] }
  0x6d   :  { %976 = vst.msk [vmem:[%s2886_s1 + $0x108] sm:$0x1] %vm276_vm5, %v968_v60  ;;  %977 = vst.msk [vmem:[%s2886_s1 + $0x120] sm:$0x1] %vm276_vm5, %v969_v61  ;;  %v1041_v20 = vld [vmem:[%s2885_s0 + $0x18b] sm:$0x1] }
  0x6e   :  { %978 = vst.msk [vmem:[%s2886_s1 + $0x138] sm:$0x1] %vm276_vm5, %v970_v62  ;;  %979 = vst.msk [vmem:[%s2886_s1 + $0x150] sm:$0x1] %vm276_vm5, %v971_v63  ;;  %v1042_v21 = vld [vmem:[%s2885_s0 + $0x18a] sm:$0x1] }
  0x6f   :  { %980 = vst.msk [vmem:[%s2886_s1 + $0x168] sm:$0x1] %vm276_vm5, %v972_v0  ;;  %981 = vst.msk [vmem:[%s2886_s1 + $0x180] sm:$0x1] %vm276_vm5, %v973_v1  ;;  %v1043_v22 = vld [vmem:[%s2885_s0 + $0x189] sm:$0x1] }
  0x70   :  { %982 = vst.msk [vmem:[%s2886_s1 + $0x198] sm:$0x1] %vm276_vm5, %v974_v2  ;;  %993 = vst.msk [vmem:[%s2886_s1 + $0x149] sm:$0x1] %vm276_vm5, %v985_v3  ;;  %v1044_v23 = vld [vmem:[%s2885_s0 + $0x188] sm:$0x1] }
  0x71   :  { %994 = vst.msk [vmem:[%s2886_s1 + $0x161] sm:$0x1] %vm276_vm5, %v986_v4  ;;  %995 = vst.msk [vmem:[%s2886_s1 + $0x179] sm:$0x1] %vm276_vm5, %v987_v5  ;;  %v1074_v24 = vld [vmem:[%s2885_s0 + $0x177] sm:$0x1] }
  0x72   :  { %996 = vst.msk [vmem:[%s2886_s1 + $0x191] sm:$0x1] %vm276_vm5, %v988_v6  ;;  %997 = vst.msk [vmem:[%s2886_s1 + $0x1a9] sm:$0x1] %vm276_vm5, %v989_v7  ;;  %v1075_v25 = vld [vmem:[%s2885_s0 + $0x176] sm:$0x1] }
  0x73   :  { %998 = vst.msk [vmem:[%s2886_s1 + $0x1c1] sm:$0x1] %vm276_vm5, %v990_v8  ;;  %999 = vst.msk [vmem:[%s2886_s1 + $0x1d9] sm:$0x1] %vm276_vm5, %v991_v9  ;;  %v1076_v26 = vld [vmem:[%s2885_s0 + $0x175] sm:$0x1] }
  0x74   :  { %1029 = vst.msk [vmem:[%s2886_s1 + $0x1f8] sm:$0x1] %vm276_vm5, %v1021_v10  ;;  %1030 = vst.msk [vmem:[%s2886_s1 + $0x210] sm:$0x1] %vm276_vm5, %v1022_v11  ;;  %v1077_v27 = vld [vmem:[%s2885_s0 + $0x174] sm:$0x1] }
  0x75   :  { %1031 = vst.msk [vmem:[%s2886_s1 + $0x228] sm:$0x1] %vm276_vm5, %v1023_v13  ;;  %1032 = vst.msk [vmem:[%s2886_s1 + $0x240] sm:$0x1] %vm276_vm5, %v1024_v12  ;;  %v1078_v28 = vld [vmem:[%s2885_s0 + $0x173] sm:$0x1] }
  0x76   :  { %1033 = vst.msk [vmem:[%s2886_s1 + $0x258] sm:$0x1] %vm276_vm5, %v1025_v14  ;;  %1034 = vst.msk [vmem:[%s2886_s1 + $0x270] sm:$0x1] %vm276_vm5, %v1026_v15  ;;  %v1079_v29 = vld [vmem:[%s2885_s0 + $0x172] sm:$0x1] }
  0x77   :  { %1035 = vst.msk [vmem:[%s2886_s1 + $0x288] sm:$0x1] %vm276_vm5, %v1027_v16  ;;  %1046 = vst.msk [vmem:[%s2886_s1 + $0x239] sm:$0x1] %vm276_vm5, %v1038_v17  ;;  %v1080_v30 = vld [vmem:[%s2885_s0 + $0x171] sm:$0x1] }
  0x78   :  { %1047 = vst.msk [vmem:[%s2886_s1 + $0x251] sm:$0x1] %vm276_vm5, %v1039_v18  ;;  %1048 = vst.msk [vmem:[%s2886_s1 + $0x269] sm:$0x1] %vm276_vm5, %v1040_v19  ;;  %v1091_v31 = vld [vmem:[%s2885_s0 + $0x20e] sm:$0x1] }
  0x79   :  { %1049 = vst.msk [vmem:[%s2886_s1 + $0x281] sm:$0x1] %vm276_vm5, %v1041_v20  ;;  %1050 = vst.msk [vmem:[%s2886_s1 + $0x299] sm:$0x1] %vm276_vm5, %v1042_v21  ;;  %v1092_v32 = vld [vmem:[%s2885_s0 + $0x20d] sm:$0x1] }
  0x7a   :  { %1051 = vst.msk [vmem:[%s2886_s1 + $0x2b1] sm:$0x1] %vm276_vm5, %v1043_v22  ;;  %1052 = vst.msk [vmem:[%s2886_s1 + $0x2c9] sm:$0x1] %vm276_vm5, %v1044_v23  ;;  %v1093_v33 = vld [vmem:[%s2885_s0 + $0x20c] sm:$0x1] }
  0x7b   :  { %1082 = vst.msk [vmem:[%s2886_s1 + $0x2e8] sm:$0x1] %vm276_vm5, %v1074_v24  ;;  %1083 = vst.msk [vmem:[%s2886_s1 + $0x300] sm:$0x1] %vm276_vm5, %v1075_v25  ;;  %v1094_v35 = vld [vmem:[%s2885_s0 + $0x20b] sm:$0x1] }
  0x7c   :  { %1084 = vst.msk [vmem:[%s2886_s1 + $0x318] sm:$0x1] %vm276_vm5, %v1076_v26  ;;  %1085 = vst.msk [vmem:[%s2886_s1 + $0x330] sm:$0x1] %vm276_vm5, %v1077_v27  ;;  %v1095_v36 = vld [vmem:[%s2885_s0 + $0x20a] sm:$0x1] }
  0x7d   :  { %1086 = vst.msk [vmem:[%s2886_s1 + $0x348] sm:$0x1] %vm276_vm5, %v1078_v28  ;;  %1087 = vst.msk [vmem:[%s2886_s1 + $0x360] sm:$0x1] %vm276_vm5, %v1079_v29  ;;  %v1096_v37 = vld [vmem:[%s2885_s0 + $0x209] sm:$0x1] }
  0x7e   :  { %1088 = vst.msk [vmem:[%s2886_s1 + $0x378] sm:$0x1] %vm276_vm5, %v1080_v30  ;;  %1099 = vst.msk [vmem:[%s2886_s1 + $0x329] sm:$0x1] %vm276_vm5, %v1091_v31  ;;  %v1097_v38 = vld [vmem:[%s2885_s0 + $0x208] sm:$0x1] }
  0x7f   :  { %1100 = vst.msk [vmem:[%s2886_s1 + $0x341] sm:$0x1] %vm276_vm5, %v1092_v32  ;;  %1101 = vst.msk [vmem:[%s2886_s1 + $0x359] sm:$0x1] %vm276_vm5, %v1093_v33  ;;  %v1126_v39 = vld [vmem:[%s2885_s0 + $0x1f7] sm:$0x1] }
  0x80   :  { %1102 = vst.msk [vmem:[%s2886_s1 + $0x371] sm:$0x1] %vm276_vm5, %v1094_v35  ;;  %1103 = vst.msk [vmem:[%s2886_s1 + $0x389] sm:$0x1] %vm276_vm5, %v1095_v36  ;;  %v1127_v40 = vld [vmem:[%s2885_s0 + $0x1f6] sm:$0x1] }
  0x81   :  { %1104 = vst.msk [vmem:[%s2886_s1 + $0x3a1] sm:$0x1] %vm276_vm5, %v1096_v37  ;;  %1105 = vst.msk [vmem:[%s2886_s1 + $0x3b9] sm:$0x1] %vm276_vm5, %v1097_v38  ;;  %v1128_v41 = vld [vmem:[%s2885_s0 + $0x1f5] sm:$0x1] }
  0x82   :  { %1134 = vst.msk [vmem:[%s2886_s1 + $0x3d8] sm:$0x1] %vm276_vm5, %v1126_v39  ;;  %1135 = vst.msk [vmem:[%s2886_s1 + $0x3f0] sm:$0x1] %vm276_vm5, %v1127_v40  ;;  %v1129_v42 = vld [vmem:[%s2885_s0 + $0x1f4] sm:$0x1] }
  0x83   :  { %1136 = vst.msk [vmem:[%s2886_s1 + $0x408] sm:$0x1] %vm276_vm5, %v1128_v41  ;;  %v1130_v43 = vld [vmem:[%s2885_s0 + $0x1f3] sm:$0x1]  ;;  %v1131_v44 = vld [vmem:[%s2885_s0 + $0x1f2] sm:$0x1] }
  0x84   :  { %1137 = vst.msk [vmem:[%s2886_s1 + $0x420] sm:$0x1] %vm276_vm5, %v1129_v42  ;;  %1138 = vst.msk [vmem:[%s2886_s1 + $0x438] sm:$0x1] %vm276_vm5, %v1130_v43  ;;  %v1132_v45 = vld [vmem:[%s2885_s0 + $0x1f1] sm:$0x1] }
  0x85   :  { %1139 = vst.msk [vmem:[%s2886_s1 + $0x450] sm:$0x1] %vm276_vm5, %v1131_v44  ;;  %v745_v46 = vld [vmem:[%s2885_s0 + $0xe] sm:$0x1]  ;;  %v746_v48 = vld [vmem:[%s2885_s0 + $0xd] sm:$0x1] }
  0x86   :  { %1140 = vst.msk [vmem:[%s2886_s1 + $0x468] sm:$0x1] %vm276_vm5, %v1132_v45  ;;  %1143 = vst.msk [vmem:[%s2886_s1 + $0x419] sm:$0x1] %vm276_vm5, %v745_v46  ;;  %v747_v49 = vld [vmem:[%s2885_s0 + $0xc] sm:$0x1] }
  0x87   :  { %1144 = vst.msk [vmem:[%s2886_s1 + $0x431] sm:$0x1] %vm276_vm5, %v746_v48  ;;  %v748_v50 = vld [vmem:[%s2885_s0 + $0xb] sm:$0x1]  ;;  %v749_v51 = vld [vmem:[%s2885_s0 + $0xa] sm:$0x1] }
  0x88   :  { %1145 = vst.msk [vmem:[%s2886_s1 + $0x449] sm:$0x1] %vm276_vm5, %v747_v49  ;;  %1146 = vst.msk [vmem:[%s2886_s1 + $0x461] sm:$0x1] %vm276_vm5, %v748_v50  ;;  %v750_v52 = vld [vmem:[%s2885_s0 + $0x9] sm:$0x1] }
  0x89   :  { %1147 = vst.msk [vmem:[%s2886_s1 + $0x479] sm:$0x1] %vm276_vm5, %v749_v51  ;;  %v751_v53 = vld [vmem:[%s2885_s0 + $0x8] sm:$0x1]  ;;  %v761_v54 = vld [vmem:[%s2885_s0] sm:$0x1] }
  0x8a   :  { %1148 = vst.msk [vmem:[%s2886_s1 + $0x491] sm:$0x1] %vm276_vm5, %v750_v52  ;;  %1149 = vst.msk [vmem:[%s2886_s1 + $0x4a9] sm:$0x1] %vm276_vm5, %v751_v53  ;;  %v780_v55 = vrot.slane %v761_v54, %v779_v47 }
  0x8b   :  { %762 = vst.msk [vmem:[%s2886_s1] sm:$0x1] %vm276_vm5, %v761_v54  ;;  %763 = vst.msk [vmem:[%s2886_s1 + $0xf0] sm:$0x1] %vm276_vm5, %v761_v54 }
  0x8c   :  { %764 = vst.msk [vmem:[%s2886_s1 + $0x1e0] sm:$0x1] %vm276_vm5, %v761_v54  ;;  %765 = vst.msk [vmem:[%s2886_s1 + $0x2d0] sm:$0x1] %vm276_vm5, %v761_v54 }
  0x8d   :  { %766 = vst.msk [vmem:[%s2886_s1 + $0x3c0] sm:$0x1] %vm276_vm5, %v761_v54  ;;  %767 = vst.msk [vmem:[%s2886_s1 + $0x11] sm:$0x1] %vm276_vm5, %v761_v54 }
  0x8e   :  { %768 = vst.msk [vmem:[%s2886_s1 + $0x29] sm:$0x1] %vm276_vm5, %v761_v54  ;;  %769 = vst.msk [vmem:[%s2886_s1 + $0x101] sm:$0x1] %vm276_vm5, %v761_v54 }
  0x8f   :  { %770 = vst.msk [vmem:[%s2886_s1 + $0x119] sm:$0x1] %vm276_vm5, %v761_v54  ;;  %771 = vst.msk [vmem:[%s2886_s1 + $0x1f1] sm:$0x1] %vm276_vm5, %v761_v54 }
  0x90   :  { %772 = vst.msk [vmem:[%s2886_s1 + $0x209] sm:$0x1] %vm276_vm5, %v761_v54  ;;  %773 = vst.msk [vmem:[%s2886_s1 + $0x2e1] sm:$0x1] %vm276_vm5, %v761_v54 }
  0x91   :  { %774 = vst.msk [vmem:[%s2886_s1 + $0x2f9] sm:$0x1] %vm276_vm5, %v761_v54  ;;  %775 = vst.msk [vmem:[%s2886_s1 + $0x3d1] sm:$0x1] %vm276_vm5, %v761_v54 }
  0x92   :  { %776 = vst.msk [vmem:[%s2886_s1 + $0x3e9] sm:$0x1] %vm276_vm5, %v761_v54 }
  0x93   :  { %1150 = vst.msk [vmem:[%s2886_s1 + $0xd8] sm:$0x3] %vm781_vm9, %v780_v55  ;;  %1151 = vst.msk [vmem:[%s2886_s1 + $0x1c8] sm:$0x3] %vm781_vm9, %v780_v55 }
  0x94   :  { %1152 = vst.msk [vmem:[%s2886_s1 + $0x2b8] sm:$0x3] %vm781_vm9, %v780_v55  ;;  %1153 = vst.msk [vmem:[%s2886_s1 + $0x3a8] sm:$0x3] %vm781_vm9, %v780_v55 }
  0x95   :  { %1154 = vst.msk [vmem:[%s2886_s1 + $0x498] sm:$0x3] %vm781_vm9, %v780_v55 }

</bundles_post_ra>
